<compile_context>
chip_gen: v7x
topology: tpu7x:2x2x1
jax: 0.10.0
libtpu: 0.0.40
codegen_flags: <defaults>
</compile_context>

<pallas_src>
import functools

import jax
import jax.numpy as jnp
from jax.experimental import pallas as pl
from jax.experimental.pallas import tpu as pltpu


NEG_BIG = -1e30   # finite "minus infinity" for key masking (exp underflows to exactly 0)
LANE = 128        # TPU lane width


def _dot_nt(a, b):
    """a [M, K] x b [N, K] -> [M, N], contracting the last dim of both (f32 accum)."""
    return jax.lax.dot_general(a, b, (((1,), (1,)), ((), ())),
                               preferred_element_type=jnp.float32)


# ----------------------------------------------------------------------------
# Kernel: one batch element per grid step, both modalities and both flows fused.
# ----------------------------------------------------------------------------
def _inter_modality_kernel(num_head,
                           v_len_ref, q_len_ref,                 # scalar prefetch (SMEM)
                           v_ref, q_ref,
                           wv_lin_ref, bv_lin_ref,
                           wq_lin_ref, bq_lin_ref,
                           wvo_x_ref, wvo_u_ref, bvo_ref,
                           wqo_x_ref, wqo_u_ref, bqo_ref,
                           ov_ref, oq_ref):
    b = pl.program_id(0)
    H = num_head
    Nv = v_ref.shape[1]
    Nq = q_ref.shape[1]
    O = wvo_u_ref.shape[0]                 # true (un-padded) output size
    dh = O // H
    scale = 1.0 / float(dh) ** 0.5
    mm_dtype = wvo_u_ref.dtype             # matmul operand dtype (f32 or bf16)

    nv = v_len_ref[b]                      # valid visual objects in this batch row
    nq = q_len_ref[b]                      # valid question tokens in this batch row

    v = v_ref[0]                           # [Nv, Dv]   (matmul_dtype)
    q = q_ref[0]                           # [Nq, Dq]

    # qkv projection: one fat lane-dense matmul per modality (f32 accumulation), then
    # zero the padded rows with a mask built in-kernel from the prefetched lengths.
    v_t = jnp.dot(v, wv_lin_ref[...], preferred_element_type=jnp.float32) + bv_lin_ref[...]
    q_t = jnp.dot(q, wq_lin_ref[...], preferred_element_type=jnp.float32) + bq_lin_ref[...]
    v_valid = jax.lax.broadcasted_iota(jnp.int32, v_t.shape, 0) < nv
    q_valid = jax.lax.broadcasted_iota(jnp.int32, q_t.shape, 0) < nq
    # Cast the masked activations to the matmul operand dtype so the attention matmuls
    # below also run bf16 when requested (review item); accumulators stay f32.
    v_t = jnp.where(v_valid, v_t, 0.0).astype(mm_dtype)    # [Nv, P3]
    q_t = jnp.where(q_valid, q_t, 0.0).astype(mm_dtype)    # [Nq, P3]

    # Additive key-mask biases, hoisted out of the head loop (f32).
    q_key_bias = jnp.where(
        jax.lax.broadcasted_iota(jnp.int32, (Nv, Nq), 1) < nq, 0.0, NEG_BIG)
    v_key_bias = jnp.where(
        jax.lax.broadcasted_iota(jnp.int32, (Nq, Nv), 1) < nv, 0.0, NEG_BIG)

    # Per-head attention.  H=4 here -> static unroll is fine; for large H switch to
    # lax.fori_loop(..., unroll=True) with pl.ds slices to bound vreg live ranges.
    v_upds = []
    q_upds = []
    for h in range(H):
        sk = slice(h * dh, (h + 1) * dh)
        sq = slice(O + h * dh, O + (h + 1) * dh)
        sv = slice(2 * O + h * dh, 2 * O + (h + 1) * dh)
        v_key, v_qry, v_val = v_t[:, sk], v_t[:, sq], v_t[:, sv]
        q_key, q_qry, q_val = q_t[:, sk], q_t[:, sq], q_t[:, sv]

        # visual queries attend over question keys/values (q -> v flow)
        lg = _dot_nt(v_qry, q_key) * scale + q_key_bias            # [Nv, Nq] f32
        mx = jnp.max(lg, axis=-1, keepdims=True)
        ex = jnp.exp(lg - mx)
        p = ex * pl.reciprocal(jnp.sum(ex, axis=-1, keepdims=True), approx=True)
        v_upds.append(jnp.dot(p.astype(mm_dtype), q_val,
                              preferred_element_type=jnp.float32))  # [Nv, dh]

        # question queries attend over visual keys/values (v -> q flow)
        lg = _dot_nt(q_qry, v_key) * scale + v_key_bias            # [Nq, Nv] f32
        mx = jnp.max(lg, axis=-1, keepdims=True)
        ex = jnp.exp(lg - mx)
        p = ex * pl.reciprocal(jnp.sum(ex, axis=-1, keepdims=True), approx=True)
        q_upds.append(jnp.dot(p.astype(mm_dtype), v_val,
                              preferred_element_type=jnp.float32))  # [Nq, dh]

    # One K=O update matmul per modality (replaces 2*H tiny K=dh matmuls).
    v_update = jnp.concatenate(v_upds, axis=-1).astype(mm_dtype)    # [Nv, O]
    q_update = jnp.concatenate(q_upds, axis=-1).astype(mm_dtype)    # [Nq, O]

    # Output projection = x @ W_out_x + update @ W_out_update + b  (== cat(x, update) @ W_out.T + b),
    # all onto a lane-dense [N, 128] accumulator; no concatenation of x with update needed.
    out_v = (jnp.dot(v, wvo_x_ref[...], preferred_element_type=jnp.float32)
             + jnp.dot(v_update, wvo_u_ref[...], preferred_element_type=jnp.float32)
             + bvo_ref[...])
    out_q = (jnp.dot(q, wqo_x_ref[...], preferred_element_type=jnp.float32)
             + jnp.dot(q_update, wqo_u_ref[...], preferred_element_type=jnp.float32)
             + bqo_ref[...])

    ov_ref[0] = out_v.astype(ov_ref.dtype)   # [Nv, PO] unmasked lane-dense store
    oq_ref[0] = out_q.astype(oq_ref.dtype)   # [Nq, PO]


# ----------------------------------------------------------------------------
# Wrapper
# ----------------------------------------------------------------------------
def _pad_lanes(a, width):
    """Zero-pad the last dim of `a` up to `width` (host-side, free)."""
    pad = width - a.shape[-1]
    if pad <= 0:
        return a
    return jnp.pad(a, [(0, 0)] * (a.ndim - 1) + [(0, pad)])


def inter_modality_update(v, q, v_mask, q_mask, params, num_head,
                          matmul_dtype=jnp.float32):
    """Fused InterModalityUpdate forward.  Returns (updated_v, updated_q), both f32."""
    B, Nv, Dv = v.shape
    _, Nq, Dq = q.shape
    w_vl, b_vl = params["v_lin"]           # [3O, Dv], [3O]
    w_ql, b_ql = params["q_lin"]           # [3O, Dq], [3O]
    w_vo, b_vo = params["v_output"]        # [O, Dv + O], [O]
    w_qo, b_qo = params["q_output"]        # [O, Dq + O], [O]
    O = w_vo.shape[0]
    H = num_head
    assert O % H == 0

    # Lane-dense padded widths (review: masked vst.msk -> unmasked vst).
    P3 = ((3 * O + LANE - 1) // LANE) * LANE
    PO = ((O + LANE - 1) // LANE) * LANE

    # Host-side weight plumbing (free): transpose for x @ W, split the output weight
    # into its raw-feature part and update part (replaces both torch.cat's), zero-pad
    # all lane dims to multiples of 128.
    wv_lin = _pad_lanes(w_vl.T, P3).astype(matmul_dtype)            # [Dv, P3]
    wq_lin = _pad_lanes(w_ql.T, P3).astype(matmul_dtype)            # [Dq, P3]
    bv_lin = _pad_lanes(b_vl.reshape(1, 3 * O), P3).astype(jnp.float32)
    bq_lin = _pad_lanes(b_ql.reshape(1, 3 * O), P3).astype(jnp.float32)
    wvo_x = _pad_lanes(w_vo[:, :Dv].T, PO).astype(matmul_dtype)     # [Dv, PO]
    wqo_x = _pad_lanes(w_qo[:, :Dq].T, PO).astype(matmul_dtype)     # [Dq, PO]
    wvo_u = _pad_lanes(w_vo[:, Dv:].T, PO).astype(matmul_dtype)     # [O,  PO]
    wqo_u = _pad_lanes(w_qo[:, Dq:].T, PO).astype(matmul_dtype)     # [O,  PO]
    bvo = _pad_lanes(b_vo.reshape(1, O), PO).astype(jnp.float32)
    bqo = _pad_lanes(b_qo.reshape(1, O), PO).astype(jnp.float32)

    # DFAF masks are prefix (length) masks; pass lengths via scalar prefetch so the
    # masks are rebuilt in-kernel (removes 1-lane-wide mask DMAs).
    v_len = jnp.sum(v_mask > 0, axis=1).astype(jnp.int32)           # [B]
    q_len = jnp.sum(q_mask > 0, axis=1).astype(jnp.int32)           # [B]

    v_in = v.astype(matmul_dtype)
    q_in = q.astype(matmul_dtype)

    kernel = functools.partial(_inter_modality_kernel, H)
    grid_spec = pltpu.PrefetchScalarGridSpec(
        num_scalar_prefetch=2,
        grid=(B,),
        in_specs=[
            pl.BlockSpec((1, Nv, Dv), lambda b, vl, ql: (b, 0, 0)),
            pl.BlockSpec((1, Nq, Dq), lambda b, vl, ql: (b, 0, 0)),
            pl.BlockSpec((Dv, P3), lambda b, vl, ql: (0, 0)),
            pl.BlockSpec((1, P3), lambda b, vl, ql: (0, 0)),
            pl.BlockSpec((Dq, P3), lambda b, vl, ql: (0, 0)),
            pl.BlockSpec((1, P3), lambda b, vl, ql: (0, 0)),
            pl.BlockSpec((Dv, PO), lambda b, vl, ql: (0, 0)),
            pl.BlockSpec((O, PO), lambda b, vl, ql: (0, 0)),
            pl.BlockSpec((1, PO), lambda b, vl, ql: (0, 0)),
            pl.BlockSpec((Dq, PO), lambda b, vl, ql: (0, 0)),
            pl.BlockSpec((O, PO), lambda b, vl, ql: (0, 0)),
            pl.BlockSpec((1, PO), lambda b, vl, ql: (0, 0)),
        ],
        out_specs=[
            pl.BlockSpec((1, Nv, PO), lambda b, vl, ql: (b, 0, 0)),
            pl.BlockSpec((1, Nq, PO), lambda b, vl, ql: (b, 0, 0)),
        ],
    )
    out_v, out_q = pl.pallas_call(
        kernel,
        out_shape=(jax.ShapeDtypeStruct((B, Nv, PO), jnp.float32),
                   jax.ShapeDtypeStruct((B, Nq, PO), jnp.float32)),
        grid_spec=grid_spec,
        compiler_params=pltpu.CompilerParams(
            # On v7x the two TensorCores each take one batch row.  On single-TC
            # v5e/v6e this is a 2-step serial loop (~0.35us/step overhead); folding B
            # into the matmul M dim there would double MXU row fill.
            dimension_semantics=("parallel",)),
    )(v_len, q_len, v_in, q_in,
      wv_lin, bv_lin, wq_lin, bq_lin,
      wvo_x, wvo_u, bvo, wqo_x, wqo_u, bqo)

    # Slice the lane padding back off (cheap XLA slice outside the kernel).
    return out_v[..., :O], out_q[..., :O]


# ----------------------------------------------------------------------------
# Pure-JAX reference (mirrors the PyTorch forward) for verification
# ----------------------------------------------------------------------------
def reference(v, q, v_mask, q_mask, params, num_head, output_size):
    O = output_size

    def lin(x, wb):
        w, b = wb
        return x @ w.T + b

    v_trans = lin(v, params["v_lin"]) * v_mask[..., None]
    q_trans = lin(q, params["q_lin"]) * q_mask[..., None]
    v_key, v_qry, v_val = v_trans[..., :O], v_trans[..., O:2 * O], v_trans[..., 2 * O:]
    q_key, q_qry, q_val = q_trans[..., :O], q_trans[..., O:2 * O], q_trans[..., 2 * O:]
    dh = O // num_head
    v_ups, q_ups = [], []
    for h in range(num_head):
        sl = slice(h * dh, (h + 1) * dh)
        q2v = jnp.einsum("bnd,bmd->bnm", v_qry[..., sl], q_key[..., sl]) / dh ** 0.5
        v2q = jnp.einsum("bmd,bnd->bmn", q_qry[..., sl], v_key[..., sl]) / dh ** 0.5
        q2v = jnp.where(q_mask[:, None, :] == 0, -jnp.inf, q2v)
        v2q = jnp.where(v_mask[:, None, :] == 0, -jnp.inf, v2q)
        v_ups.append(jnp.einsum("bnm,bmd->bnd", jax.nn.softmax(q2v, -1), q_val[..., sl]))
        q_ups.append(jnp.einsum("bmn,bnd->bmd", jax.nn.softmax(v2q, -1), v_val[..., sl]))
    v_update = jnp.concatenate(v_ups, -1)
    q_update = jnp.concatenate(q_ups, -1)
    updated_v = lin(jnp.concatenate([v, v_update], -1), params["v_output"])
    updated_q = lin(jnp.concatenate([q, q_update], -1), params["q_output"])
    return updated_v, updated_q


# ----------------------------------------------------------------------------
# Main
# ----------------------------------------------------------------------------
if __name__ == "__main__":
    B, NUM_OBJ, MAX_LEN = 2, 16, 8
    V_SIZE = Q_SIZE = OUTPUT_SIZE = 32
    NUM_HEAD = 4

    key = jax.random.PRNGKey(0)
    ks = jax.random.split(key, 8)

    def init_linear(k, in_size, out_size):
        k1, k2 = jax.random.split(k)
        w = jax.random.normal(k1, (out_size, in_size), jnp.float32) * 0.1
        b = jax.random.normal(k2, (out_size,), jnp.float32) * 0.1
        return (w, b)

    # weight_norm(Linear) == plain Linear at forward; drop=0 => dropout is a no-op.
    params = {
        "v_lin":    init_linear(ks[0], V_SIZE, 3 * OUTPUT_SIZE),
        "q_lin":    init_linear(ks[1], Q_SIZE, 3 * OUTPUT_SIZE),
        "v_output": init_linear(ks[2], V_SIZE + OUTPUT_SIZE, OUTPUT_SIZE),
        "q_output": init_linear(ks[3], Q_SIZE + OUTPUT_SIZE, OUTPUT_SIZE),
    }

    v = jax.random.normal(ks[4], (B, NUM_OBJ, V_SIZE), jnp.float32)
    q = jax.random.normal(ks[5], (B, MAX_LEN, Q_SIZE), jnp.float32)
    v_len = jnp.array([16, 10])
    q_len = jnp.array([8, 5])
    v_mask = (jnp.arange(NUM_OBJ)[None, :] < v_len[:, None]).astype(jnp.float32)
    q_mask = (jnp.arange(MAX_LEN)[None, :] < q_len[:, None]).astype(jnp.float32)

    ref_v, ref_q = reference(v, q, v_mask, q_mask, params, NUM_HEAD, OUTPUT_SIZE)

    # f32 matmul-operand path (reference precision).
    out_v, out_q = inter_modality_update(v, q, v_mask, q_mask, params, NUM_HEAD)
    out_v = jax.block_until_ready(out_v)
    out_q = jax.block_until_ready(out_q)
    assert out_v.shape == (B, NUM_OBJ, OUTPUT_SIZE) and out_q.shape == (B, MAX_LEN, OUTPUT_SIZE)
    assert jnp.max(jnp.abs(out_v - ref_v)) < 1e-2, "v mismatch (f32)"
    assert jnp.max(jnp.abs(out_q - ref_q)) < 1e-2, "q mismatch (f32)"

    # bf16 matmul-operand path (all generations incl. v5e; softmax/accum math stays f32).
    out_v_bf, out_q_bf = inter_modality_update(v, q, v_mask, q_mask, params, NUM_HEAD,
                                               matmul_dtype=jnp.bfloat16)
    out_v_bf = jax.block_until_ready(out_v_bf)
    out_q_bf = jax.block_until_ready(out_q_bf)
    assert jnp.max(jnp.abs(out_v_bf - ref_v)) < 5e-2, "v mismatch (bf16)"
    assert jnp.max(jnp.abs(out_q_bf - ref_q)) < 5e-2, "q mismatch (bf16)"

    print("KERNEL_OK")
</pallas_src>

<mosaic_0001>
module attributes {stable_mosaic.version = 11 : i64} {
  func.func @_inter_modality_kernel(%arg0: i32, %arg1: memref<2xi32, #tpu.memory_space<smem>>, %arg2: memref<2xi32, #tpu.memory_space<smem>>, %arg3: memref<1x16x32xf32, #tpu.memory_space<vmem>>, %arg4: memref<1x8x32xf32, #tpu.memory_space<vmem>>, %arg5: memref<32x128xf32, #tpu.memory_space<vmem>>, %arg6: memref<1x128xf32, #tpu.memory_space<vmem>>, %arg7: memref<32x128xf32, #tpu.memory_space<vmem>>, %arg8: memref<1x128xf32, #tpu.memory_space<vmem>>, %arg9: memref<32x128xf32, #tpu.memory_space<vmem>>, %arg10: memref<32x128xf32, #tpu.memory_space<vmem>>, %arg11: memref<1x128xf32, #tpu.memory_space<vmem>>, %arg12: memref<32x128xf32, #tpu.memory_space<vmem>>, %arg13: memref<32x128xf32, #tpu.memory_space<vmem>>, %arg14: memref<1x128xf32, #tpu.memory_space<vmem>>, %arg15: memref<1x16x128xf32, #tpu.memory_space<vmem>>, %arg16: memref<1x8x128xf32, #tpu.memory_space<vmem>>) attributes {dimension_semantics = [#tpu.dimension_semantics<parallel>], iteration_bounds = array<i64: 2>, scalar_prefetch = 2 : i64, scratch_operands = 0 : i64, tpu.core_type = #tpu.core_type<tc>, window_params = [{transform_indices = @transform_0, window_bounds = array<i64: 1, 16, 32>}, {transform_indices = @transform_1, window_bounds = array<i64: 1, 8, 32>}, {pipeline_mode = #tpu.pipeline_mode<synchronous>, transform_indices = @transform_2, window_bounds = array<i64: 32, 128>}, {pipeline_mode = #tpu.pipeline_mode<synchronous>, transform_indices = @transform_3, window_bounds = array<i64: 1, 128>}, {pipeline_mode = #tpu.pipeline_mode<synchronous>, transform_indices = @transform_4, window_bounds = array<i64: 32, 128>}, {pipeline_mode = #tpu.pipeline_mode<synchronous>, transform_indices = @transform_5, window_bounds = array<i64: 1, 128>}, {pipeline_mode = #tpu.pipeline_mode<synchronous>, transform_indices = @transform_6, window_bounds = array<i64: 32, 128>}, {pipeline_mode = #tpu.pipeline_mode<synchronous>, transform_indices = @transform_7, window_bounds = array<i64: 32, 128>}, {pipeline_mode = #tpu.pipeline_mode<synchronous>, transform_indices = @transform_8, window_bounds = array<i64: 1, 128>}, {pipeline_mode = #tpu.pipeline_mode<synchronous>, transform_indices = @transform_9, window_bounds = array<i64: 32, 128>}, {pipeline_mode = #tpu.pipeline_mode<synchronous>, transform_indices = @transform_10, window_bounds = array<i64: 32, 128>}, {pipeline_mode = #tpu.pipeline_mode<synchronous>, transform_indices = @transform_11, window_bounds = array<i64: 1, 128>}, {transform_indices = @transform_12, window_bounds = array<i64: 1, 16, 128>}, {transform_indices = @transform_13, window_bounds = array<i64: 1, 8, 128>}]} {
    %0 = arith.index_cast %arg0 : i32 to index
    %1 = memref.load %arg1[%0] : memref<2xi32, #tpu.memory_space<smem>>
    %2 = arith.index_cast %arg0 : i32 to index
    %3 = memref.load %arg2[%2] : memref<2xi32, #tpu.memory_space<smem>>
    %c0 = arith.constant 0 : index
    %c0_0 = arith.constant 0 : index
    %c0_1 = arith.constant 0 : index
    %4 = vector.load %arg3[%c0, %c0_0, %c0_1] : memref<1x16x32xf32, #tpu.memory_space<vmem>>, vector<1x16x32xf32>
    %5 = vector.shape_cast %4 : vector<1x16x32xf32> to vector<16x32xf32>
    %c0_2 = arith.constant 0 : index
    %c0_3 = arith.constant 0 : index
    %c0_4 = arith.constant 0 : index
    %6 = vector.load %arg4[%c0_2, %c0_3, %c0_4] : memref<1x8x32xf32, #tpu.memory_space<vmem>>, vector<1x8x32xf32>
    %7 = vector.shape_cast %6 : vector<1x8x32xf32> to vector<8x32xf32>
    %c0_5 = arith.constant 0 : index
    %c0_6 = arith.constant 0 : index
    %8 = vector.load %arg5[%c0_5, %c0_6] : memref<32x128xf32, #tpu.memory_space<vmem>>, vector<32x128xf32>
    %cst = arith.constant dense<0.000000e+00> : vector<16x128xf32>
    %9 = tpu.matmul %5, %8, %cst {dimension_numbers = #tpu.dot_dimension_numbers<[1], [0], [0], [1], [0, 0, 1, 1], [], []>} : vector<16x32xf32>, vector<32x128xf32>, vector<16x128xf32> -> vector<16x128xf32>
    %c0_7 = arith.constant 0 : index
    %c0_8 = arith.constant 0 : index
    %10 = vector.load %arg6[%c0_7, %c0_8] : memref<1x128xf32, #tpu.memory_space<vmem>>, vector<1x128xf32>
    %11 = vector.broadcast %10 : vector<1x128xf32> to vector<16x128xf32>
    %12 = arith.addf %9, %11 : vector<16x128xf32>
    %c0_9 = arith.constant 0 : index
    %c0_10 = arith.constant 0 : index
    %13 = vector.load %arg7[%c0_9, %c0_10] : memref<32x128xf32, #tpu.memory_space<vmem>>, vector<32x128xf32>
    %cst_11 = arith.constant dense<0.000000e+00> : vector<8x128xf32>
    %14 = tpu.matmul %7, %13, %cst_11 {dimension_numbers = #tpu.dot_dimension_numbers<[1], [0], [0], [1], [0, 0, 1, 1], [], []>} : vector<8x32xf32>, vector<32x128xf32>, vector<8x128xf32> -> vector<8x128xf32>
    %c0_12 = arith.constant 0 : index
    %c0_13 = arith.constant 0 : index
    %15 = vector.load %arg8[%c0_12, %c0_13] : memref<1x128xf32, #tpu.memory_space<vmem>>, vector<1x128xf32>
    %16 = vector.broadcast %15 : vector<1x128xf32> to vector<8x128xf32>
    %17 = arith.addf %14, %16 : vector<8x128xf32>
    %18 = tpu.iota {dimensions = array<i32: 0>} : vector<16x128xi32>
    %19 = vector.broadcast %1 : i32 to vector<16x128xi32>
    %20 = arith.cmpi slt, %18, %19 : vector<16x128xi32>
    %21 = tpu.iota {dimensions = array<i32: 0>} : vector<8x128xi32>
    %22 = vector.broadcast %3 : i32 to vector<8x128xi32>
    %23 = arith.cmpi slt, %21, %22 : vector<8x128xi32>
    %cst_14 = arith.constant 0.000000e+00 : f32
    %24 = vector.broadcast %cst_14 : f32 to vector<16x128xf32>
    %25 = arith.select %20, %12, %24 : vector<16x128xi1>, vector<16x128xf32>
    %cst_15 = arith.constant 0.000000e+00 : f32
    %26 = vector.broadcast %cst_15 : f32 to vector<8x128xf32>
    %27 = arith.select %23, %17, %26 : vector<8x128xi1>, vector<8x128xf32>
    %28 = tpu.iota {dimensions = array<i32: 1>} : vector<16x8xi32>
    %29 = vector.broadcast %3 : i32 to vector<16x8xi32>
    %30 = arith.cmpi slt, %28, %29 : vector<16x8xi32>
    %cst_16 = arith.constant 0.000000e+00 : f32
    %cst_17 = arith.constant -1.000000e+30 : f32
    %31 = vector.broadcast %cst_16 : f32 to vector<16x8xf32>
    %32 = vector.broadcast %cst_17 : f32 to vector<16x8xf32>
    %33 = arith.select %30, %31, %32 : vector<16x8xi1>, vector<16x8xf32>
    %34 = tpu.iota {dimensions = array<i32: 1>} : vector<8x16xi32>
    %35 = vector.broadcast %1 : i32 to vector<8x16xi32>
    %36 = arith.cmpi slt, %34, %35 : vector<8x16xi32>
    %cst_18 = arith.constant 0.000000e+00 : f32
    %cst_19 = arith.constant -1.000000e+30 : f32
    %37 = vector.broadcast %cst_18 : f32 to vector<8x16xf32>
    %38 = vector.broadcast %cst_19 : f32 to vector<8x16xf32>
    %39 = arith.select %36, %37, %38 : vector<8x16xi1>, vector<8x16xf32>
    %40 = vector.extract_strided_slice %25 {offsets = [0, 0], sizes = [16, 8], strides = [1, 1]} : vector<16x128xf32> to vector<16x8xf32>
    %41 = vector.extract_strided_slice %25 {offsets = [0, 32], sizes = [16, 8], strides = [1, 1]} : vector<16x128xf32> to vector<16x8xf32>
    %42 = vector.extract_strided_slice %25 {offsets = [0, 64], sizes = [16, 8], strides = [1, 1]} : vector<16x128xf32> to vector<16x8xf32>
    %43 = vector.extract_strided_slice %27 {offsets = [0, 0], sizes = [8, 8], strides = [1, 1]} : vector<8x128xf32> to vector<8x8xf32>
    %44 = vector.extract_strided_slice %27 {offsets = [0, 32], sizes = [8, 8], strides = [1, 1]} : vector<8x128xf32> to vector<8x8xf32>
    %45 = vector.extract_strided_slice %27 {offsets = [0, 64], sizes = [8, 8], strides = [1, 1]} : vector<8x128xf32> to vector<8x8xf32>
    %cst_20 = arith.constant dense<0.000000e+00> : vector<16x8xf32>
    %46 = tpu.matmul %41, %43, %cst_20 {dimension_numbers = #tpu.dot_dimension_numbers<[1], [1], [0], [0], [0, 0, 1, 0], [], []>} : vector<16x8xf32>, vector<8x8xf32>, vector<16x8xf32> -> vector<16x8xf32>
    %cst_21 = arith.constant 0.353553385 : f32
    %47 = vector.broadcast %cst_21 : f32 to vector<16x8xf32>
    %48 = arith.mulf %46, %47 : vector<16x8xf32>
    %49 = arith.addf %48, %33 : vector<16x8xf32>
    %cst_22 = arith.constant dense<0xFF800000> : vector<16xf32>
    %50 = vector.multi_reduction <maximumf>, %49, %cst_22 [1] : vector<16x8xf32> to vector<16xf32>
    %51 = vector.shape_cast %50 : vector<16xf32> to vector<16x1xf32>
    %52 = vector.broadcast %51 : vector<16x1xf32> to vector<16x8xf32>
    %53 = arith.subf %49, %52 : vector<16x8xf32>
    %54 = math.exp %53 : vector<16x8xf32>
    %cst_23 = arith.constant dense<0.000000e+00> : vector<16xf32>
    %55 = vector.multi_reduction <add>, %54, %cst_23 [1] : vector<16x8xf32> to vector<16xf32>
    %56 = vector.shape_cast %55 : vector<16xf32> to vector<16x1xf32>
    %57 = tpu.reciprocal %56 {approx = true} : vector<16x1xf32> -> vector<16x1xf32>
    %58 = vector.broadcast %57 : vector<16x1xf32> to vector<16x8xf32>
    %59 = arith.mulf %54, %58 : vector<16x8xf32>
    %cst_24 = arith.constant dense<0.000000e+00> : vector<16x8xf32>
    %60 = tpu.matmul %59, %45, %cst_24 {dimension_numbers = #tpu.dot_dimension_numbers<[1], [0], [0], [1], [0, 0, 1, 1], [], []>} : vector<16x8xf32>, vector<8x8xf32>, vector<16x8xf32> -> vector<16x8xf32>
    %cst_25 = arith.constant dense<0.000000e+00> : vector<8x16xf32>
    %61 = tpu.matmul %44, %40, %cst_25 {dimension_numbers = #tpu.dot_dimension_numbers<[1], [1], [0], [0], [0, 0, 1, 0], [], []>} : vector<8x8xf32>, vector<16x8xf32>, vector<8x16xf32> -> vector<8x16xf32>
    %cst_26 = arith.constant 0.353553385 : f32
    %62 = vector.broadcast %cst_26 : f32 to vector<8x16xf32>
    %63 = arith.mulf %61, %62 : vector<8x16xf32>
    %64 = arith.addf %63, %39 : vector<8x16xf32>
    %cst_27 = arith.constant dense<0xFF800000> : vector<8xf32>
    %65 = vector.multi_reduction <maximumf>, %64, %cst_27 [1] : vector<8x16xf32> to vector<8xf32>
    %66 = vector.shape_cast %65 : vector<8xf32> to vector<8x1xf32>
    %67 = vector.broadcast %66 : vector<8x1xf32> to vector<8x16xf32>
    %68 = arith.subf %64, %67 : vector<8x16xf32>
    %69 = math.exp %68 : vector<8x16xf32>
    %cst_28 = arith.constant dense<0.000000e+00> : vector<8xf32>
    %70 = vector.multi_reduction <add>, %69, %cst_28 [1] : vector<8x16xf32> to vector<8xf32>
    %71 = vector.shape_cast %70 : vector<8xf32> to vector<8x1xf32>
    %72 = tpu.reciprocal %71 {approx = true} : vector<8x1xf32> -> vector<8x1xf32>
    %73 = vector.broadcast %72 : vector<8x1xf32> to vector<8x16xf32>
    %74 = arith.mulf %69, %73 : vector<8x16xf32>
    %cst_29 = arith.constant dense<0.000000e+00> : vector<8x8xf32>
    %75 = tpu.matmul %74, %42, %cst_29 {dimension_numbers = #tpu.dot_dimension_numbers<[1], [0], [0], [1], [0, 0, 1, 1], [], []>} : vector<8x16xf32>, vector<16x8xf32>, vector<8x8xf32> -> vector<8x8xf32>
    %76 = vector.extract_strided_slice %25 {offsets = [0, 8], sizes = [16, 8], strides = [1, 1]} : vector<16x128xf32> to vector<16x8xf32>
    %77 = vector.extract_strided_slice %25 {offsets = [0, 40], sizes = [16, 8], strides = [1, 1]} : vector<16x128xf32> to vector<16x8xf32>
    %78 = vector.extract_strided_slice %25 {offsets = [0, 72], sizes = [16, 8], strides = [1, 1]} : vector<16x128xf32> to vector<16x8xf32>
    %79 = vector.extract_strided_slice %27 {offsets = [0, 8], sizes = [8, 8], strides = [1, 1]} : vector<8x128xf32> to vector<8x8xf32>
    %80 = vector.extract_strided_slice %27 {offsets = [0, 40], sizes = [8, 8], strides = [1, 1]} : vector<8x128xf32> to vector<8x8xf32>
    %81 = vector.extract_strided_slice %27 {offsets = [0, 72], sizes = [8, 8], strides = [1, 1]} : vector<8x128xf32> to vector<8x8xf32>
    %cst_30 = arith.constant dense<0.000000e+00> : vector<16x8xf32>
    %82 = tpu.matmul %77, %79, %cst_30 {dimension_numbers = #tpu.dot_dimension_numbers<[1], [1], [0], [0], [0, 0, 1, 0], [], []>} : vector<16x8xf32>, vector<8x8xf32>, vector<16x8xf32> -> vector<16x8xf32>
    %cst_31 = arith.constant 0.353553385 : f32
    %83 = vector.broadcast %cst_31 : f32 to vector<16x8xf32>
    %84 = arith.mulf %82, %83 : vector<16x8xf32>
    %85 = arith.addf %84, %33 : vector<16x8xf32>
    %cst_32 = arith.constant dense<0xFF800000> : vector<16xf32>
    %86 = vector.multi_reduction <maximumf>, %85, %cst_32 [1] : vector<16x8xf32> to vector<16xf32>
    %87 = vector.shape_cast %86 : vector<16xf32> to vector<16x1xf32>
    %88 = vector.broadcast %87 : vector<16x1xf32> to vector<16x8xf32>
    %89 = arith.subf %85, %88 : vector<16x8xf32>
    %90 = math.exp %89 : vector<16x8xf32>
    %cst_33 = arith.constant dense<0.000000e+00> : vector<16xf32>
    %91 = vector.multi_reduction <add>, %90, %cst_33 [1] : vector<16x8xf32> to vector<16xf32>
    %92 = vector.shape_cast %91 : vector<16xf32> to vector<16x1xf32>
    %93 = tpu.reciprocal %92 {approx = true} : vector<16x1xf32> -> vector<16x1xf32>
    %94 = vector.broadcast %93 : vector<16x1xf32> to vector<16x8xf32>
    %95 = arith.mulf %90, %94 : vector<16x8xf32>
    %cst_34 = arith.constant dense<0.000000e+00> : vector<16x8xf32>
    %96 = tpu.matmul %95, %81, %cst_34 {dimension_numbers = #tpu.dot_dimension_numbers<[1], [0], [0], [1], [0, 0, 1, 1], [], []>} : vector<16x8xf32>, vector<8x8xf32>, vector<16x8xf32> -> vector<16x8xf32>
    %cst_35 = arith.constant dense<0.000000e+00> : vector<8x16xf32>
    %97 = tpu.matmul %80, %76, %cst_35 {dimension_numbers = #tpu.dot_dimension_numbers<[1], [1], [0], [0], [0, 0, 1, 0], [], []>} : vector<8x8xf32>, vector<16x8xf32>, vector<8x16xf32> -> vector<8x16xf32>
    %cst_36 = arith.constant 0.353553385 : f32
    %98 = vector.broadcast %cst_36 : f32 to vector<8x16xf32>
    %99 = arith.mulf %97, %98 : vector<8x16xf32>
    %100 = arith.addf %99, %39 : vector<8x16xf32>
    %cst_37 = arith.constant dense<0xFF800000> : vector<8xf32>
    %101 = vector.multi_reduction <maximumf>, %100, %cst_37 [1] : vector<8x16xf32> to vector<8xf32>
    %102 = vector.shape_cast %101 : vector<8xf32> to vector<8x1xf32>
    %103 = vector.broadcast %102 : vector<8x1xf32> to vector<8x16xf32>
    %104 = arith.subf %100, %103 : vector<8x16xf32>
    %105 = math.exp %104 : vector<8x16xf32>
    %cst_38 = arith.constant dense<0.000000e+00> : vector<8xf32>
    %106 = vector.multi_reduction <add>, %105, %cst_38 [1] : vector<8x16xf32> to vector<8xf32>
    %107 = vector.shape_cast %106 : vector<8xf32> to vector<8x1xf32>
    %108 = tpu.reciprocal %107 {approx = true} : vector<8x1xf32> -> vector<8x1xf32>
    %109 = vector.broadcast %108 : vector<8x1xf32> to vector<8x16xf32>
    %110 = arith.mulf %105, %109 : vector<8x16xf32>
    %cst_39 = arith.constant dense<0.000000e+00> : vector<8x8xf32>
    %111 = tpu.matmul %110, %78, %cst_39 {dimension_numbers = #tpu.dot_dimension_numbers<[1], [0], [0], [1], [0, 0, 1, 1], [], []>} : vector<8x16xf32>, vector<16x8xf32>, vector<8x8xf32> -> vector<8x8xf32>
    %112 = vector.extract_strided_slice %25 {offsets = [0, 16], sizes = [16, 8], strides = [1, 1]} : vector<16x128xf32> to vector<16x8xf32>
    %113 = vector.extract_strided_slice %25 {offsets = [0, 48], sizes = [16, 8], strides = [1, 1]} : vector<16x128xf32> to vector<16x8xf32>
    %114 = vector.extract_strided_slice %25 {offsets = [0, 80], sizes = [16, 8], strides = [1, 1]} : vector<16x128xf32> to vector<16x8xf32>
    %115 = vector.extract_strided_slice %27 {offsets = [0, 16], sizes = [8, 8], strides = [1, 1]} : vector<8x128xf32> to vector<8x8xf32>
    %116 = vector.extract_strided_slice %27 {offsets = [0, 48], sizes = [8, 8], strides = [1, 1]} : vector<8x128xf32> to vector<8x8xf32>
    %117 = vector.extract_strided_slice %27 {offsets = [0, 80], sizes = [8, 8], strides = [1, 1]} : vector<8x128xf32> to vector<8x8xf32>
    %cst_40 = arith.constant dense<0.000000e+00> : vector<16x8xf32>
    %118 = tpu.matmul %113, %115, %cst_40 {dimension_numbers = #tpu.dot_dimension_numbers<[1], [1], [0], [0], [0, 0, 1, 0], [], []>} : vector<16x8xf32>, vector<8x8xf32>, vector<16x8xf32> -> vector<16x8xf32>
    %cst_41 = arith.constant 0.353553385 : f32
    %119 = vector.broadcast %cst_41 : f32 to vector<16x8xf32>
    %120 = arith.mulf %118, %119 : vector<16x8xf32>
    %121 = arith.addf %120, %33 : vector<16x8xf32>
    %cst_42 = arith.constant dense<0xFF800000> : vector<16xf32>
    %122 = vector.multi_reduction <maximumf>, %121, %cst_42 [1] : vector<16x8xf32> to vector<16xf32>
    %123 = vector.shape_cast %122 : vector<16xf32> to vector<16x1xf32>
    %124 = vector.broadcast %123 : vector<16x1xf32> to vector<16x8xf32>
    %125 = arith.subf %121, %124 : vector<16x8xf32>
    %126 = math.exp %125 : vector<16x8xf32>
    %cst_43 = arith.constant dense<0.000000e+00> : vector<16xf32>
    %127 = vector.multi_reduction <add>, %126, %cst_43 [1] : vector<16x8xf32> to vector<16xf32>
    %128 = vector.shape_cast %127 : vector<16xf32> to vector<16x1xf32>
    %129 = tpu.reciprocal %128 {approx = true} : vector<16x1xf32> -> vector<16x1xf32>
    %130 = vector.broadcast %129 : vector<16x1xf32> to vector<16x8xf32>
    %131 = arith.mulf %126, %130 : vector<16x8xf32>
    %cst_44 = arith.constant dense<0.000000e+00> : vector<16x8xf32>
    %132 = tpu.matmul %131, %117, %cst_44 {dimension_numbers = #tpu.dot_dimension_numbers<[1], [0], [0], [1], [0, 0, 1, 1], [], []>} : vector<16x8xf32>, vector<8x8xf32>, vector<16x8xf32> -> vector<16x8xf32>
    %cst_45 = arith.constant dense<0.000000e+00> : vector<8x16xf32>
    %133 = tpu.matmul %116, %112, %cst_45 {dimension_numbers = #tpu.dot_dimension_numbers<[1], [1], [0], [0], [0, 0, 1, 0], [], []>} : vector<8x8xf32>, vector<16x8xf32>, vector<8x16xf32> -> vector<8x16xf32>
    %cst_46 = arith.constant 0.353553385 : f32
    %134 = vector.broadcast %cst_46 : f32 to vector<8x16xf32>
    %135 = arith.mulf %133, %134 : vector<8x16xf32>
    %136 = arith.addf %135, %39 : vector<8x16xf32>
    %cst_47 = arith.constant dense<0xFF800000> : vector<8xf32>
    %137 = vector.multi_reduction <maximumf>, %136, %cst_47 [1] : vector<8x16xf32> to vector<8xf32>
    %138 = vector.shape_cast %137 : vector<8xf32> to vector<8x1xf32>
    %139 = vector.broadcast %138 : vector<8x1xf32> to vector<8x16xf32>
    %140 = arith.subf %136, %139 : vector<8x16xf32>
    %141 = math.exp %140 : vector<8x16xf32>
    %cst_48 = arith.constant dense<0.000000e+00> : vector<8xf32>
    %142 = vector.multi_reduction <add>, %141, %cst_48 [1] : vector<8x16xf32> to vector<8xf32>
    %143 = vector.shape_cast %142 : vector<8xf32> to vector<8x1xf32>
    %144 = tpu.reciprocal %143 {approx = true} : vector<8x1xf32> -> vector<8x1xf32>
    %145 = vector.broadcast %144 : vector<8x1xf32> to vector<8x16xf32>
    %146 = arith.mulf %141, %145 : vector<8x16xf32>
    %cst_49 = arith.constant dense<0.000000e+00> : vector<8x8xf32>
    %147 = tpu.matmul %146, %114, %cst_49 {dimension_numbers = #tpu.dot_dimension_numbers<[1], [0], [0], [1], [0, 0, 1, 1], [], []>} : vector<8x16xf32>, vector<16x8xf32>, vector<8x8xf32> -> vector<8x8xf32>
    %148 = vector.extract_strided_slice %25 {offsets = [0, 24], sizes = [16, 8], strides = [1, 1]} : vector<16x128xf32> to vector<16x8xf32>
    %149 = vector.extract_strided_slice %25 {offsets = [0, 56], sizes = [16, 8], strides = [1, 1]} : vector<16x128xf32> to vector<16x8xf32>
    %150 = vector.extract_strided_slice %25 {offsets = [0, 88], sizes = [16, 8], strides = [1, 1]} : vector<16x128xf32> to vector<16x8xf32>
    %151 = vector.extract_strided_slice %27 {offsets = [0, 24], sizes = [8, 8], strides = [1, 1]} : vector<8x128xf32> to vector<8x8xf32>
    %152 = vector.extract_strided_slice %27 {offsets = [0, 56], sizes = [8, 8], strides = [1, 1]} : vector<8x128xf32> to vector<8x8xf32>
    %153 = vector.extract_strided_slice %27 {offsets = [0, 88], sizes = [8, 8], strides = [1, 1]} : vector<8x128xf32> to vector<8x8xf32>
    %cst_50 = arith.constant dense<0.000000e+00> : vector<16x8xf32>
    %154 = tpu.matmul %149, %151, %cst_50 {dimension_numbers = #tpu.dot_dimension_numbers<[1], [1], [0], [0], [0, 0, 1, 0], [], []>} : vector<16x8xf32>, vector<8x8xf32>, vector<16x8xf32> -> vector<16x8xf32>
    %cst_51 = arith.constant 0.353553385 : f32
    %155 = vector.broadcast %cst_51 : f32 to vector<16x8xf32>
    %156 = arith.mulf %154, %155 : vector<16x8xf32>
    %157 = arith.addf %156, %33 : vector<16x8xf32>
    %cst_52 = arith.constant dense<0xFF800000> : vector<16xf32>
    %158 = vector.multi_reduction <maximumf>, %157, %cst_52 [1] : vector<16x8xf32> to vector<16xf32>
    %159 = vector.shape_cast %158 : vector<16xf32> to vector<16x1xf32>
    %160 = vector.broadcast %159 : vector<16x1xf32> to vector<16x8xf32>
    %161 = arith.subf %157, %160 : vector<16x8xf32>
    %162 = math.exp %161 : vector<16x8xf32>
    %cst_53 = arith.constant dense<0.000000e+00> : vector<16xf32>
    %163 = vector.multi_reduction <add>, %162, %cst_53 [1] : vector<16x8xf32> to vector<16xf32>
    %164 = vector.shape_cast %163 : vector<16xf32> to vector<16x1xf32>
    %165 = tpu.reciprocal %164 {approx = true} : vector<16x1xf32> -> vector<16x1xf32>
    %166 = vector.broadcast %165 : vector<16x1xf32> to vector<16x8xf32>
    %167 = arith.mulf %162, %166 : vector<16x8xf32>
    %cst_54 = arith.constant dense<0.000000e+00> : vector<16x8xf32>
    %168 = tpu.matmul %167, %153, %cst_54 {dimension_numbers = #tpu.dot_dimension_numbers<[1], [0], [0], [1], [0, 0, 1, 1], [], []>} : vector<16x8xf32>, vector<8x8xf32>, vector<16x8xf32> -> vector<16x8xf32>
    %cst_55 = arith.constant dense<0.000000e+00> : vector<8x16xf32>
    %169 = tpu.matmul %152, %148, %cst_55 {dimension_numbers = #tpu.dot_dimension_numbers<[1], [1], [0], [0], [0, 0, 1, 0], [], []>} : vector<8x8xf32>, vector<16x8xf32>, vector<8x16xf32> -> vector<8x16xf32>
    %cst_56 = arith.constant 0.353553385 : f32
    %170 = vector.broadcast %cst_56 : f32 to vector<8x16xf32>
    %171 = arith.mulf %169, %170 : vector<8x16xf32>
    %172 = arith.addf %171, %39 : vector<8x16xf32>
    %cst_57 = arith.constant dense<0xFF800000> : vector<8xf32>
    %173 = vector.multi_reduction <maximumf>, %172, %cst_57 [1] : vector<8x16xf32> to vector<8xf32>
    %174 = vector.shape_cast %173 : vector<8xf32> to vector<8x1xf32>
    %175 = vector.broadcast %174 : vector<8x1xf32> to vector<8x16xf32>
    %176 = arith.subf %172, %175 : vector<8x16xf32>
    %177 = math.exp %176 : vector<8x16xf32>
    %cst_58 = arith.constant dense<0.000000e+00> : vector<8xf32>
    %178 = vector.multi_reduction <add>, %177, %cst_58 [1] : vector<8x16xf32> to vector<8xf32>
    %179 = vector.shape_cast %178 : vector<8xf32> to vector<8x1xf32>
    %180 = tpu.reciprocal %179 {approx = true} : vector<8x1xf32> -> vector<8x1xf32>
    %181 = vector.broadcast %180 : vector<8x1xf32> to vector<8x16xf32>
    %182 = arith.mulf %177, %181 : vector<8x16xf32>
    %cst_59 = arith.constant dense<0.000000e+00> : vector<8x8xf32>
    %183 = tpu.matmul %182, %150, %cst_59 {dimension_numbers = #tpu.dot_dimension_numbers<[1], [0], [0], [1], [0, 0, 1, 1], [], []>} : vector<8x16xf32>, vector<16x8xf32>, vector<8x8xf32> -> vector<8x8xf32>
    %184 = tpu.concatenate %60, %96, %132, %168 in 1 : vector<16x8xf32>, vector<16x8xf32>, vector<16x8xf32>, vector<16x8xf32> -> vector<16x32xf32>
    %185 = tpu.concatenate %75, %111, %147, %183 in 1 : vector<8x8xf32>, vector<8x8xf32>, vector<8x8xf32>, vector<8x8xf32> -> vector<8x32xf32>
    %c0_60 = arith.constant 0 : index
    %c0_61 = arith.constant 0 : index
    %186 = vector.load %arg9[%c0_60, %c0_61] : memref<32x128xf32, #tpu.memory_space<vmem>>, vector<32x128xf32>
    %cst_62 = arith.constant dense<0.000000e+00> : vector<16x128xf32>
    %187 = tpu.matmul %5, %186, %cst_62 {dimension_numbers = #tpu.dot_dimension_numbers<[1], [0], [0], [1], [0, 0, 1, 1], [], []>} : vector<16x32xf32>, vector<32x128xf32>, vector<16x128xf32> -> vector<16x128xf32>
    %c0_63 = arith.constant 0 : index
    %c0_64 = arith.constant 0 : index
    %188 = vector.load %arg10[%c0_63, %c0_64] : memref<32x128xf32, #tpu.memory_space<vmem>>, vector<32x128xf32>
    %cst_65 = arith.constant dense<0.000000e+00> : vector<16x128xf32>
    %189 = tpu.matmul %184, %188, %cst_65 {dimension_numbers = #tpu.dot_dimension_numbers<[1], [0], [0], [1], [0, 0, 1, 1], [], []>} : vector<16x32xf32>, vector<32x128xf32>, vector<16x128xf32> -> vector<16x128xf32>
    %190 = arith.addf %187, %189 : vector<16x128xf32>
    %c0_66 = arith.constant 0 : index
    %c0_67 = arith.constant 0 : index
    %191 = vector.load %arg11[%c0_66, %c0_67] : memref<1x128xf32, #tpu.memory_space<vmem>>, vector<1x128xf32>
    %192 = vector.broadcast %191 : vector<1x128xf32> to vector<16x128xf32>
    %193 = arith.addf %190, %192 : vector<16x128xf32>
    %c0_68 = arith.constant 0 : index
    %c0_69 = arith.constant 0 : index
    %194 = vector.load %arg12[%c0_68, %c0_69] : memref<32x128xf32, #tpu.memory_space<vmem>>, vector<32x128xf32>
    %cst_70 = arith.constant dense<0.000000e+00> : vector<8x128xf32>
    %195 = tpu.matmul %7, %194, %cst_70 {dimension_numbers = #tpu.dot_dimension_numbers<[1], [0], [0], [1], [0, 0, 1, 1], [], []>} : vector<8x32xf32>, vector<32x128xf32>, vector<8x128xf32> -> vector<8x128xf32>
    %c0_71 = arith.constant 0 : index
    %c0_72 = arith.constant 0 : index
    %196 = vector.load %arg13[%c0_71, %c0_72] : memref<32x128xf32, #tpu.memory_space<vmem>>, vector<32x128xf32>
    %cst_73 = arith.constant dense<0.000000e+00> : vector<8x128xf32>
    %197 = tpu.matmul %185, %196, %cst_73 {dimension_numbers = #tpu.dot_dimension_numbers<[1], [0], [0], [1], [0, 0, 1, 1], [], []>} : vector<8x32xf32>, vector<32x128xf32>, vector<8x128xf32> -> vector<8x128xf32>
    %198 = arith.addf %195, %197 : vector<8x128xf32>
    %c0_74 = arith.constant 0 : index
    %c0_75 = arith.constant 0 : index
    %199 = vector.load %arg14[%c0_74, %c0_75] : memref<1x128xf32, #tpu.memory_space<vmem>>, vector<1x128xf32>
    %200 = vector.broadcast %199 : vector<1x128xf32> to vector<8x128xf32>
    %201 = arith.addf %198, %200 : vector<8x128xf32>
    %c0_76 = arith.constant 0 : index
    %c0_77 = arith.constant 0 : index
    %c0_78 = arith.constant 0 : index
    %202 = vector.load %arg15[%c0_76, %c0_77, %c0_78] : memref<1x16x128xf32, #tpu.memory_space<vmem>>, vector<1x16x128xf32>
    %203 = vector.shape_cast %202 : vector<1x16x128xf32> to vector<16x128xf32>
    %204 = vector.shape_cast %193 : vector<16x128xf32> to vector<1x16x128xf32>
    tpu.vector_store %arg15[%c0_76, %c0_77, %c0_78], %204 {strides = array<i32>} : memref<1x16x128xf32, #tpu.memory_space<vmem>>, vector<1x16x128xf32>,
    %c0_79 = arith.constant 0 : index
    %c0_80 = arith.constant 0 : index
    %c0_81 = arith.constant 0 : index
    %205 = vector.load %arg16[%c0_79, %c0_80, %c0_81] : memref<1x8x128xf32, #tpu.memory_space<vmem>>, vector<1x8x128xf32>
    %206 = vector.shape_cast %205 : vector<1x8x128xf32> to vector<8x128xf32>
    %207 = vector.shape_cast %201 : vector<8x128xf32> to vector<1x8x128xf32>
    tpu.vector_store %arg16[%c0_79, %c0_80, %c0_81], %207 {strides = array<i32>} : memref<1x8x128xf32, #tpu.memory_space<vmem>>, vector<1x8x128xf32>,
    return
  }
  func.func @transform_0(%arg0: i32, %arg1: memref<2xi32, #tpu.memory_space<smem>>, %arg2: memref<2xi32, #tpu.memory_space<smem>>) -> (i32, i32, i32) {
    %c0_i32 = arith.constant 0 : i32
    %c0_i32_0 = arith.constant 0 : i32
    %c0_i32_1 = arith.constant 0 : i32
    return %arg0, %c0_i32, %c0_i32_0 : i32, i32, i32
  }
  func.func @transform_1(%arg0: i32, %arg1: memref<2xi32, #tpu.memory_space<smem>>, %arg2: memref<2xi32, #tpu.memory_space<smem>>) -> (i32, i32, i32) {
    %c0_i32 = arith.constant 0 : i32
    %c0_i32_0 = arith.constant 0 : i32
    %c0_i32_1 = arith.constant 0 : i32
    return %arg0, %c0_i32, %c0_i32_0 : i32, i32, i32
  }
  func.func @transform_2(%arg0: i32, %arg1: memref<2xi32, #tpu.memory_space<smem>>, %arg2: memref<2xi32, #tpu.memory_space<smem>>) -> (i32, i32) {
    %c0_i32 = arith.constant 0 : i32
    %c0_i32_0 = arith.constant 0 : i32
    %c0_i32_1 = arith.constant 0 : i32
    return %c0_i32, %c0_i32_0 : i32, i32
  }
  func.func @transform_3(%arg0: i32, %arg1: memref<2xi32, #tpu.memory_space<smem>>, %arg2: memref<2xi32, #tpu.memory_space<smem>>) -> (i32, i32) {
    %c0_i32 = arith.constant 0 : i32
    %c0_i32_0 = arith.constant 0 : i32
    %c0_i32_1 = arith.constant 0 : i32
    return %c0_i32, %c0_i32_0 : i32, i32
  }
  func.func @transform_4(%arg0: i32, %arg1: memref<2xi32, #tpu.memory_space<smem>>, %arg2: memref<2xi32, #tpu.memory_space<smem>>) -> (i32, i32) {
    %c0_i32 = arith.constant 0 : i32
    %c0_i32_0 = arith.constant 0 : i32
    %c0_i32_1 = arith.constant 0 : i32
    return %c0_i32, %c0_i32_0 : i32, i32
  }
  func.func @transform_5(%arg0: i32, %arg1: memref<2xi32, #tpu.memory_space<smem>>, %arg2: memref<2xi32, #tpu.memory_space<smem>>) -> (i32, i32) {
    %c0_i32 = arith.constant 0 : i32
    %c0_i32_0 = arith.constant 0 : i32
    %c0_i32_1 = arith.constant 0 : i32
    return %c0_i32, %c0_i32_0 : i32, i32
  }
  func.func @transform_6(%arg0: i32, %arg1: memref<2xi32, #tpu.memory_space<smem>>, %arg2: memref<2xi32, #tpu.memory_space<smem>>) -> (i32, i32) {
    %c0_i32 = arith.constant 0 : i32
    %c0_i32_0 = arith.constant 0 : i32
    %c0_i32_1 = arith.constant 0 : i32
    return %c0_i32, %c0_i32_0 : i32, i32
  }
  func.func @transform_7(%arg0: i32, %arg1: memref<2xi32, #tpu.memory_space<smem>>, %arg2: memref<2xi32, #tpu.memory_space<smem>>) -> (i32, i32) {
    %c0_i32 = arith.constant 0 : i32
    %c0_i32_0 = arith.constant 0 : i32
    %c0_i32_1 = arith.constant 0 : i32
    return %c0_i32, %c0_i32_0 : i32, i32
  }
  func.func @transform_8(%arg0: i32, %arg1: memref<2xi32, #tpu.memory_space<smem>>, %arg2: memref<2xi32, #tpu.memory_space<smem>>) -> (i32, i32) {
    %c0_i32 = arith.constant 0 : i32
    %c0_i32_0 = arith.constant 0 : i32
    %c0_i32_1 = arith.constant 0 : i32
    return %c0_i32, %c0_i32_0 : i32, i32
  }
  func.func @transform_9(%arg0: i32, %arg1: memref<2xi32, #tpu.memory_space<smem>>, %arg2: memref<2xi32, #tpu.memory_space<smem>>) -> (i32, i32) {
    %c0_i32 = arith.constant 0 : i32
    %c0_i32_0 = arith.constant 0 : i32
    %c0_i32_1 = arith.constant 0 : i32
    return %c0_i32, %c0_i32_0 : i32, i32
  }
  func.func @transform_10(%arg0: i32, %arg1: memref<2xi32, #tpu.memory_space<smem>>, %arg2: memref<2xi32, #tpu.memory_space<smem>>) -> (i32, i32) {
    %c0_i32 = arith.constant 0 : i32
    %c0_i32_0 = arith.constant 0 : i32
    %c0_i32_1 = arith.constant 0 : i32
    return %c0_i32, %c0_i32_0 : i32, i32
  }
  func.func @transform_11(%arg0: i32, %arg1: memref<2xi32, #tpu.memory_space<smem>>, %arg2: memref<2xi32, #tpu.memory_space<smem>>) -> (i32, i32) {
    %c0_i32 = arith.constant 0 : i32
    %c0_i32_0 = arith.constant 0 : i32
    %c0_i32_1 = arith.constant 0 : i32
    return %c0_i32, %c0_i32_0 : i32, i32
  }
  func.func @transform_12(%arg0: i32, %arg1: memref<2xi32, #tpu.memory_space<smem>>, %arg2: memref<2xi32, #tpu.memory_space<smem>>) -> (i32, i32, i32) {
    %c0_i32 = arith.constant 0 : i32
    %c0_i32_0 = arith.constant 0 : i32
    %c0_i32_1 = arith.constant 0 : i32
    return %arg0, %c0_i32, %c0_i32_0 : i32, i32, i32
  }
  func.func @transform_13(%arg0: i32, %arg1: memref<2xi32, #tpu.memory_space<smem>>, %arg2: memref<2xi32, #tpu.memory_space<smem>>) -> (i32, i32, i32) {
    %c0_i32 = arith.constant 0 : i32
    %c0_i32_0 = arith.constant 0 : i32
    %c0_i32_1 = arith.constant 0 : i32
    return %arg0, %c0_i32, %c0_i32_0 : i32, i32, i32
  }
}

</mosaic_0001>

<bundles_post_ra>
// kernel: tpu_custom_call.1
= control target key start
LH: loop header
LB: loop body
LE: loop exit
PB: predicated region body
PF: predicated region fallthrough
CT: control target
= control target key end

     0   :  { %s4682_s0 = inlined_call_operand.hbm [shape: s32[2], index: 0, kind: input, shape index: {}]   ;;  %s4683_s2 = inlined_call_operand.hbm [shape: f32[2,16,32], index: 2, kind: input, shape index: {}]   ;;  %s4684_s3 = inlined_call_operand.hbm [shape: f32[2,8,32], index: 3, kind: input, shape index: {}]   ;;  %s4685_s4 = inlined_call_operand.hbm [shape: f32[32,128], index: 4, kind: input, shape index: {}]   ;;  %s4686_s5 = inlined_call_operand.vmem [shape: f32[1,128], index: 5, kind: input, shape index: {}]   ;;  %s4687_s6 = inlined_call_operand.hbm [shape: f32[32,128], index: 6, kind: input, shape index: {}]   ;;  %s4688_s7 = inlined_call_operand.hbm [shape: f32[1,128], index: 7, kind: input, shape index: {}]   ;;  %s4689_s8 = inlined_call_operand.hbm [shape: f32[32,128], index: 8, kind: input, shape index: {}]   ;;  %s4690_s9 = inlined_call_operand.vmem [shape: f32[32,128], index: 9, kind: input, shape index: {}]   ;;  %s4691_s10 = inlined_call_operand.vmem [shape: f32[1,128], index: 10, kind: input, shape index: {}]   ;;  %s4692_s11 = inlined_call_operand.hbm [shape: f32[32,128], index: 11, kind: input, shape index: {}]   ;;  %s4693_s12 = inlined_call_operand.hbm [shape: f32[32,128], index: 12, kind: input, shape index: {}]   ;;  %s4694_s13 = inlined_call_operand.vmem [shape: f32[1,128], index: 13, kind: input, shape index: {}]   ;;  %s4695_s14 = inlined_call_operand.hbm [shape: f32[2,16,128], index: 14, kind: output, shape index: {0}]   ;;  %s4696_s15 = inlined_call_operand.hbm [shape: f32[2,8,128], index: 15, kind: output, shape index: {1}]   ;;  %s4697_s1 = inlined_call_operand.vmem [shape: s32[2], index: 1, kind: input, shape index: {}]  }
   0x1   :  { %4707 = sst [smem:[#allocation31_spill]] %s4683_s2  ;;  %s3503_s20 = scalar_lea.hbm %s4682_s0, 16 }
   0x2   :  { %4708 = sst [smem:[#allocation32_spill]] %s4685_s4  ;;  %p3504_p0 = scmp.ne.s32.totalorder %s4682_s0, %s3503_s20 }
   0x3   :  { %4709 = sst [smem:[#allocation33_spill]] %s4687_s6  ;;  %p3507_p1 = scmp.lt.u32.totalorder %s3503_s20, %s4682_s0 }
   0x4   :  { %4710 = sst [smem:[#allocation34_spill]] %s4688_s7 }
   0x5   :  { %4711 = sst [smem:[#allocation35_spill]] %s4689_s8  ;;  %p3509_p2 = pnand %p3507_p1, %p3504_p0 }
   0x6   :  { %4712 = sst [smem:[#allocation36_spill]] %s4690_s9 }
   0x7   :  { %4713 = sst [smem:[#allocation37_spill]] %s4691_s10 }
   0x8   :  { %4714 = sst [smem:[#allocation38_spill]] %s4692_s11 }
   0x9   :  { %4715 = sst [smem:[#allocation39_spill]] %s4694_s13 }
   0xa   :  { %4716 = sst [smem:[#allocation40_spill]] %s4695_s14 }
   0xb   :  { %4717 = sst [smem:[#allocation41_spill]] %s4696_s15 }
   0xc   :  { %3512 = shalt.err (!%p3509_p2)  }
   0xd   :  { %s3875_s25 = smov [#allocation3]   ;;  %s23_s30 = sshll.u32 %s4697_s1, 4  ;;  %s24_s30 = int_to_ptr.vmem [resolvable:$true] %s23_s30 }
   0xe   :  { %22 = dma.hbm_to_smem %s4682_s0, 16, %s3875_s25, [#allocation2] }
   0xf   :  { %s3513_s16 = scalar_lea.vmem %s24_s30, 16  ;;  %p3518_p4 = scmp.lt.s32.totalorder %s24_s30, %s24_s30 }
  0x10   :  { %p3514_p3 = scmp.ne.s32.totalorder %s24_s30, %s3513_s16  ;;  %p3519_p5 = scmp.lt.s32.totalorder %s3513_s16, %s3513_s16 }
  0x12   :  { %p3520_p6 = por %p3519_p5, %p3518_p4 }
  0x14   :  { %p3521_p7 = pnand %p3520_p6, %p3514_p3 }
  0x16   :  { %3524 = shalt.err (!%p3521_p7)  }
  0x17   :  { %s3876_s17 = smov [#allocation4]  }
  0x18   :  { %26 = dma.vmem_to_smem %s24_s30, 16, %s3876_s17, [#allocation2] }
  0x19   :  { %3825 = dma.done.wait [#allocation2], 32 }
  0x1a   :  { %3826 = vsyncadd [#allocation2], 4294967264 }
  0x1b   :  { %28 = sfence }
  0x1c   :  { %29 = vsyncpa [#allocation6], 0 }
  0x1d   :  { %31 = vsyncpa [#allocation6 + $0x1], 0 }
  0x1e   :  { %32 = vsyncpa [#allocation9], 0 }
  0x1f   :  { %34 = vsyncpa [#allocation9 + $0x1], 0 }
  0x20   :  { %35 = vsyncpa [#allocation12], 0 }
  0x21   :  { %36 = vsyncpa [#allocation15], 0 }
  0x22   :  { %37 = vsyncpa [#allocation18], 0 }
  0x23   :  { %38 = vsyncpa [#allocation7], 0 }
  0x24   :  { %40 = vsyncpa [#allocation7 + $0x1], 0 }
  0x25   :  { %41 = vsyncpa [#allocation21], 0 }
  0x26   :  { %43 = vsyncpa [#allocation21 + $0x1], 0  ;;  %s4003_s0 = smov 0   ;;  %s4005_s1 = smov 0  }
  0x27   :  { %s4007_s18 = smov 0   ;;  %s4009_s19 = smov 0  }
  0x28 LB: > { %s3877_s20 = smov [#allocation10]   ;;  %s4024_s22 = sadd.s32 4294967295, %s3873_s19   ;;  %s3873_s19 = sphi %s4009_s19, %s4761_s19   ;;  %s3869_s18 = sphi %s4007_s18, %s4760_s18   ;;  %s3865_s1 = sphi %s4005_s1, %s4759_s1   ;;  %s3861_s0 = sphi %s4003_s0, %s4758_s0  }
  0x29   : > { %s380_s21 = sshll.u32 %s3877_s20, 4  ;;  %p2883_p8 = scmp.ge.s32.totalorder %s3873_s19, 1  ;;  %s4029_s21 = int_to_ptr.vmem [resolvable:$true] %s380_s21 }
  0x2a   : > { %p4701_p9 = scmp.eq.s32.totalorder %s4024_s22, 0  ;;  %p368_p10 = scmp.lt.s32.totalorder %s3873_s19, 3 }
  0x2b   : > { %s3878_s24 = smov [#allocation11]   ;;  %s3879_s27 = smov [#allocation14]  }
  0x2c   : > { %p4031_p11 = pnand %p2883_p8, %p368_p10  ;;  %s396_s25 = sshll.u32 %s3878_s24, 4  ;;  %s4044_s25 = int_to_ptr.vmem [resolvable:$true] %s396_s25 }
  0x2d   : > { %s420_s28 = sshll.u32 %s3879_s27, 4  ;;  %s4720_s4 = sld [smem:[#allocation32_spill]]  ;;  %s4046_s28 = int_to_ptr.vmem [resolvable:$true] %s420_s28 }
  0x2e   : > { %s4718_s23 = scalar_select %p4031_p11, 1, 0 }
  0x2f   : > { %p3312_p13 = pneg %p4031_p11 }
  0x31   : > { %p4040_p0 = pnand %p3312_p13, %p4701_p9 }
  0x33   : > { %s3525_s16 = scalar_lea.hbm %s4720_s4, 512  ;;  %p4056_p2 = pneg %p4040_p0 }
  0x34   : > { %p3526_p1 = scmp.ne.s32.totalorder %s4720_s4, %s3525_s16  ;;  %p3532_p5 = scmp.lt.u32.totalorder %s3525_s16, %s4720_s4 }
  0x36   : > { %p3528_p3 = pnand %p4056_p2, %p3526_p1 }
  0x38   : > { %p3529_p4 = pneg %p3528_p3 }
  0x3a   : > { %p3534_p6 = pnand %p3532_p5, %p3529_p4 }
  0x3c   : > { %3537 = shalt.err (!%p3534_p6)
}
  0x3d   : > { %s3538_s29 = scalar_lea.vmem %s4029_s21, 512  ;;  %p3546_p13 = scmp.lt.s32.totalorder %s4029_s21, %s4029_s21 }
  0x3e   : > { %p3539_p7 = scmp.ne.s32.totalorder %s4029_s21, %s3538_s29  ;;  %p3547_p12 = scmp.lt.s32.totalorder %s3538_s29, %s3538_s29 }
  0x40   : > { %p3541_p8 = pnand %p3539_p7, %p4056_p2  ;;  %p3548_p1 = por %p3547_p12, %p3546_p13 }
  0x42   : > { %p3542_p10 = pneg %p3541_p8 }
  0x44   : > { %p3549_p3 = pnand %p3548_p1, %p3542_p10 }
  0x46   : > { %3552 = shalt.err (!%p3549_p3)
}
  0x47   : > { %s4703_s30 = smov 128   ;;  %s4704_s15 = smov 8  }
  0x48   : > { %3315 = dma.hbm_to_vmem [thread:$0]  (!%p4040_p0), %s4720_s4, 512, %s4029_s21, [#allocation9], %s4703_s30, %s4703_s30, %s4704_s15  }
  0x49   : > { %s4722_s6 = sld [smem:[#allocation33_spill]] }
  0x4f   : > { %s3553_s29 = scalar_lea.hbm %s4722_s6, 512 }
  0x50   : > { %p3554_p12 = scmp.ne.s32.totalorder %s4722_s6, %s3553_s29  ;;  %p3560_p6 = scmp.lt.u32.totalorder %s3553_s29, %s4722_s6 }
  0x52   : > { %p3556_p4 = pnand %p3554_p12, %p4056_p2 }
  0x54   : > { %p3557_p5 = pneg %p3556_p4 }
  0x56   : > { %p3562_p7 = pnand %p3560_p6, %p3557_p5 }
  0x58   : > { %3565 = shalt.err (!%p3562_p7)
}
  0x59   : > { %s3566_s21 = scalar_lea.vmem %s4044_s25, 512  ;;  %p3574_p1 = scmp.lt.s32.totalorder %s4044_s25, %s4044_s25 }
  0x5a   : > { %p3567_p8 = scmp.ne.s32.totalorder %s4044_s25, %s3566_s21  ;;  %p3575_p3 = scmp.lt.s32.totalorder %s3566_s21, %s3566_s21 }
  0x5c   : > { %p3569_p10 = pnand %p3567_p8, %p4056_p2  ;;  %p3576_p12 = por %p3575_p3, %p3574_p1 }
  0x5e   : > { %p3570_p13 = pneg %p3569_p10 }
  0x60   : > { %p3577_p4 = pnand %p3576_p12, %p3570_p13 }
  0x62   : > { %3580 = shalt.err (!%p3577_p4)
}
  0x63   : > { %3318 = dma.hbm_to_vmem [thread:$0]  (!%p4040_p0), %s4722_s6, 512, %s4044_s25, [#allocation12], %s4703_s30, %s4703_s30, %s4704_s15  }
  0x64   : > { %s4723_s8 = sld [smem:[#allocation35_spill]] }
  0x6a   : > { %s3581_s16 = scalar_lea.hbm %s4723_s8, 512 }
  0x6b   : > { %p3582_p5 = scmp.ne.s32.totalorder %s4723_s8, %s3581_s16  ;;  %p3588_p8 = scmp.lt.u32.totalorder %s3581_s16, %s4723_s8 }
  0x6d   : > { %p3584_p6 = pnand %p3582_p5, %p4056_p2 }
  0x6f   : > { %p3585_p7 = pneg %p3584_p6 }
  0x71   : > { %p3590_p10 = pnand %p3588_p8, %p3585_p7 }
  0x73   : > { %3593 = shalt.err (!%p3590_p10)
}
  0x74   : > { %s3594_s25 = scalar_lea.vmem %s4046_s28, 512  ;;  %p3602_p12 = scmp.lt.s32.totalorder %s4046_s28, %s4046_s28 }
  0x75   : > { %p3595_p13 = scmp.ne.s32.totalorder %s4046_s28, %s3594_s25  ;;  %p3603_p4 = scmp.lt.s32.totalorder %s3594_s25, %s3594_s25 }
  0x77   : > { %p3597_p1 = pnand %p3595_p13, %p4056_p2  ;;  %p3604_p5 = por %p3603_p4, %p3602_p12 }
  0x79   : > { %p3598_p3 = pneg %p3597_p1 }
  0x7b   : > { %p3605_p6 = pnand %p3604_p5, %p3598_p3 }
  0x7d   : > { %3608 = shalt.err (!%p3605_p6)
}
  0x7e   : > { %3324 = dma.hbm_to_vmem [thread:$0]  (!%p4040_p0), %s4723_s8, 512, %s4046_s28, [#allocation15], %s4703_s30, %s4703_s30, %s4704_s15  }
  0x7f   : > { %s3882_s10 = smov [#allocation13]   ;;  %s3883_s14 = smov [#allocation16]  }
  0x80   : > { %s410_s13 = sshll.u32 %s3882_s10, 4  ;;  %s439_s16 = sshll.u32 %s3883_s14, 4  ;;  %s411_s13 = int_to_ptr.vmem [resolvable:$true] %s410_s13  ;;  %s440_s16 = int_to_ptr.vmem [resolvable:$true] %s439_s16 }
  0x81   : > { %s4724_s7 = sld [smem:[#allocation34_spill]] }
  0x87   : > { %s3609_s27 = scalar_lea.hbm %s4724_s7, 16 }
  0x88   : > { %p3610_p7 = scmp.ne.s32.totalorder %s4724_s7, %s3609_s27  ;;  %p3616_p13 = scmp.lt.u32.totalorder %s3609_s27, %s4724_s7 }
  0x8a   : > { %p3612_p8 = pnand %p3610_p7, %p4056_p2 }
  0x8c   : > { %p3613_p10 = pneg %p3612_p8 }
  0x8e   : > { %p3618_p1 = pnand %p3616_p13, %p3613_p10 }
  0x90   : > { %3621 = shalt.err (!%p3618_p1)
}
  0x91   : > { %s3622_s28 = scalar_lea.vmem %s411_s13, 16  ;;  %s3629_s9 = scalar_lea.vmem %s411_s13, 32 }
  0x92   : > { %p3623_p3 = scmp.ne.s32.totalorder %s411_s13, %s3622_s28  ;;  %p3630_p5 = scmp.lt.s32.totalorder %s411_s13, %s411_s13 }
  0x93   : > { %p3631_p6 = scmp.lt.s32.totalorder %s3629_s9, %s3622_s28 }
  0x94   : > { %p3625_p12 = pnand %p3623_p3, %p4056_p2 }
  0x95   : > { %p3632_p9 = por %p3631_p6, %p3630_p5 }
  0x96   : > { %p3626_p4 = pneg %p3625_p12 }
  0x98   : > { %p3633_p11 = pnand %p3632_p9, %p3626_p4 }
  0x9a   : > { %3636 = shalt.err (!%p3633_p11)
}
  0x9b   : > { %3321 = dma.hbm_to_vmem [thread:$0]  (!%p4040_p0), %s4724_s7, 16, %s411_s13, [#allocation12]  }
  0x9c   : > { %s4725_s11 = sld [smem:[#allocation38_spill]] }
  0xa2   : > { %s3637_s20 = scalar_lea.hbm %s4725_s11, 512 }
  0xa3   : > { %p3638_p7 = scmp.ne.s32.totalorder %s4725_s11, %s3637_s20  ;;  %p3644_p11 = scmp.lt.u32.totalorder %s3637_s20, %s4725_s11 }
  0xa5   : > { %p3640_p8 = pnand %p3638_p7, %p4056_p2 }
  0xa7   : > { %p3641_p9 = pneg %p3640_p8 }
  0xa9   : > { %p3646_p10 = pnand %p3644_p11, %p3641_p9 }
  0xab   : > { %3649 = shalt.err (!%p3646_p10)
}
  0xac   : > { %s3650_s28 = scalar_lea.vmem %s440_s16, 512  ;;  %p3658_p12 = scmp.lt.s32.totalorder %s440_s16, %s440_s16 }
  0xad   : > { %p3651_p13 = scmp.ne.s32.totalorder %s440_s16, %s3650_s28  ;;  %p3659_p4 = scmp.lt.s32.totalorder %s3650_s28, %s3650_s28 }
  0xaf   : > { %p3653_p1 = pnand %p3651_p13, %p4056_p2  ;;  %p3660_p5 = por %p3659_p4, %p3658_p12 }
  0xb1   : > { %p3654_p3 = pneg %p3653_p1 }
  0xb3   : > { %p3661_p6 = pnand %p3660_p5, %p3654_p3 }
  0xb5   : > { %3664 = shalt.err (!%p3661_p6)
}
  0xb6   : > { %3327 = dma.hbm_to_vmem [thread:$0]  (!%p4040_p0), %s4725_s11, 512, %s440_s16, [#allocation15], %s4703_s30, %s4703_s30, %s4704_s15  }
  0xb7   : > { %s3884_s10 = smov [#allocation17]   ;;  %s3665_s20 = scalar_lea.hbm %s4693_s12, 512 }
  0xb8   : > { %s452_s14 = sshll.u32 %s3884_s10, 4  ;;  %p3666_p7 = scmp.ne.s32.totalorder %s4693_s12, %s3665_s20  ;;  %s453_s14 = int_to_ptr.vmem [resolvable:$true] %s452_s14 }
  0xb9   : > { %p3672_p11 = scmp.lt.u32.totalorder %s3665_s20, %s4693_s12 }
  0xba   : > { %p3668_p8 = pnand %p3666_p7, %p4056_p2 }
  0xbc   : > { %p3669_p9 = pneg %p3668_p8 }
  0xbe   : > { %p3674_p10 = pnand %p3672_p11, %p3669_p9 }
  0xc0   : > { %3677 = shalt.err (!%p3674_p10)
}
  0xc1   : > { %s3678_s16 = scalar_lea.vmem %s453_s14, 512  ;;  %p3686_p12 = scmp.lt.s32.totalorder %s453_s14, %s453_s14 }
  0xc2   : > { %p3679_p13 = scmp.ne.s32.totalorder %s453_s14, %s3678_s16  ;;  %p3687_p4 = scmp.lt.s32.totalorder %s3678_s16, %s3678_s16 }
  0xc4   : > { %p3681_p1 = pnand %p3679_p13, %p4056_p2  ;;  %p3688_p5 = por %p3687_p4, %p3686_p12 }
  0xc6   : > { %p3682_p3 = pneg %p3681_p1 }
  0xc8   : > { %p3689_p6 = pnand %p3688_p5, %p3682_p3 }
  0xca   : > { %3692 = shalt.err (!%p3689_p6)
}
  0xcb   : > { %3330 = dma.hbm_to_vmem [thread:$0]  (!%p4040_p0), %s4693_s12, 512, %s453_s14, [#allocation18], %s4703_s30, %s4703_s30, %s4704_s15  }
  0xcc   : > { %s2882_s26 = sadd.s32 4294967294, %s3873_s19   ;;  %s4194_s24 = sadd.s32 1, %s3873_s19  }
  0xcd   : > { %s53_s9 = ssub.s32 %s3873_s19, %s4194_s24  ;;  %s56_s10 = sadd.s32 1, %s3869_s18 }
  0xce   : > { %p54_p2 = scmp.eq.s32.totalorder %s53_s9, 0  ;;  %p63_p7 = scmp.ne.s32.totalorder %s3869_s18, %s3865_s1 }
  0xcf   : > { %p64_p8 = scmp.eq.s32.totalorder %s3873_s19, 0  ;;  %p69_p9 = scmp.ne.s32.totalorder %s3865_s1, %s3861_s0 }
  0xd0   : > { %s4205_s4 = scalar_select %p54_p2, %s3869_s18, %s56_s10  }
  0xd1   : > { %p4207_p11 = por %p64_p8, %p63_p7  ;;  %p4727_p10 = scmp.eq.s32.totalorder %s4024_s22, 0 }
  0xd2   : > { %p329_p13 = scmp.eq.s32.totalorder %s4024_s22, 1  ;;  %p335_p1 = scmp.eq.s32.totalorder %s2882_s26, 1 }
  0xd3   : > { %p4213_p0 = por %p4727_p10, %p69_p9  ;;  %p3351_p3 = scmp.lt.s32.totalorder %s3873_s19, 2 }
  0xd4   : > { %s4220_s20 = sand.u32 1, %s3869_s18   ;;  %p4222_p12 = por %p329_p13, %p63_p7 }
  0xd5   : > { %s4728_s14 = scalar_select %p4213_p0, 1, 0 }
  0xd6   : > { %s4729_s27 = scalar_select %p4222_p12, 1, 0 }
  0xd7   : > { %p4226_p4 = por %p335_p1, %p69_p9  ;;  %s2891_s25 = sshll.u32 %s4220_s20, 4 }
  0xd8   : > { %s2963_s21 = sshll.u32 %s3873_s19, 8  ;;  %s4731_s2 = sld [smem:[#allocation31_spill]] }
  0xd9   : > { %s4730_s29 = scalar_select %p4226_p4, 1, 0 }
  0xda   : > { %s473_s26 = scalar_lea.vmem [#allocation5], %s2891_s25  ;;  %p4241_p5 = pnand %p3351_p3, %p4207_p11 }
  0xdb   : > { %s480_s9 = sshll.u32 %s473_s26, 4  ;;  %s2894_s15 = sshll.u32 %s4220_s20, 3  ;;  %s4237_s9 = int_to_ptr.vmem [resolvable:$true] %s480_s9 }
  0xdc   : > { %s470_s16 = scalar_lea.sflag [#allocation6], %s4220_s20  ;;  %p3695_p2 = pneg %p4241_p5 }
  0xde   : > { %s4235_s13 = scalar_lea.hbm %s4731_s2, %s2963_s21  ;;  %s3698_s17 = scalar_lea.hbm %s4731_s2, 512 }
  0xdf   : > { %s3693_s21 = scalar_lea.hbm %s4235_s13, 256  ;;  %p3699_p9 = scmp.lt.u32.totalorder %s4235_s13, %s4731_s2 }
  0xe0   : > { %p3694_p6 = scmp.ne.s32.totalorder %s4235_s13, %s3693_s21  ;;  %p3700_p11 = scmp.lt.u32.totalorder %s3698_s17, %s3693_s21 }
  0xe1   : > { %p3702_p13 = scmp.lt.u32.totalorder %s3693_s21, %s4235_s13 }
  0xe2   : > { %p3696_p7 = pnand %p3695_p2, %p3694_p6  ;;  %p3701_p10 = por %p3700_p11, %p3699_p9 }
  0xe4   : > { %p3697_p8 = pneg %p3696_p7  ;;  %p3703_p1 = por %p3702_p13, %p3701_p10 }
  0xe6   : > { %p3704_p3 = pnand %p3703_p1, %p3697_p8 }
  0xe8   : > { %3707 = shalt.err (!%p3704_p3)
}
  0xe9   : > { %s3708_s30 = scalar_lea.vmem %s4237_s9, 256  ;;  %s3885_s25 = smov [#allocation5]  }
  0xea   : > { %p3709_p6 = scmp.ne.s32.totalorder %s4237_s9, %s3708_s30  ;;  %s3713_s28 = sshll.u32 %s3885_s25, 4  ;;  %s3714_s28 = int_to_ptr.vmem [resolvable:$false] %s3713_s28 }
  0xeb   : > { %s3715_s6 = scalar_lea.vmem %s3714_s28, 512  ;;  %p3716_p12 = scmp.lt.s32.totalorder %s4237_s9, %s3714_s28 }
  0xec   : > { %p3711_p7 = pnand %p3709_p6, %p3695_p2  ;;  %p3717_p9 = scmp.lt.s32.totalorder %s3715_s6, %s3708_s30 }
  0xee   : > { %p3712_p4 = pneg %p3711_p7  ;;  %p3718_p11 = por %p3717_p9, %p3716_p12 }
  0xf0   : > { %p3719_p10 = pnand %p3718_p11, %p3712_p4 }
  0xf2   : > { %3722 = shalt.err (!%p3719_p10)
}
  0xf3   : > { %s4733_s21 = smov 8   ;;  %s4734_s17 = smov 128  }
  0xf4   : > { %3334 = dma.hbm_to_vmem [thread:$0]  (!%p4241_p5), %s4235_s13, 256, %s4237_s9, %s470_s16, %s4734_s17, %s4734_s17, %s4733_s21  }
  0xf5   : > { %s2895_s26 = sshll.u32 %s3873_s19, 7  ;;  %s494_s6 = scalar_lea.vmem [#allocation8], %s2894_s15 }
  0xf6   : > { %s4282_s28 = scalar_lea.hbm %s4684_s3, %s2895_s26  ;;  %s501_s2 = sshll.u32 %s494_s6, 4  ;;  %s502_s2 = int_to_ptr.vmem [resolvable:$true] %s501_s2 }
  0xf7   : > { %s4735_s7 = sand.u32 1, %s3873_s19   ;;  %s3723_s11 = scalar_lea.hbm %s4282_s28, 128 }
  0xf8   : > { %s491_s8 = scalar_lea.sflag [#allocation9], %s4735_s7  ;;  %p3724_p12 = scmp.ne.s32.totalorder %s4282_s28, %s3723_s11 }
  0xf9   : > { %s3728_s16 = scalar_lea.hbm %s4684_s3, 256  ;;  %p3729_p13 = scmp.lt.u32.totalorder %s4282_s28, %s4684_s3 }
  0xfa   : > { %p3726_p4 = pnand %p3724_p12, %p3695_p2  ;;  %p3730_p1 = scmp.lt.u32.totalorder %s3728_s16, %s3723_s11 }
  0xfb   : > { %p3732_p6 = scmp.lt.u32.totalorder %s3723_s11, %s4282_s28 }
  0xfc   : > { %p3727_p8 = pneg %p3726_p4  ;;  %p3731_p3 = por %p3730_p1, %p3729_p13 }
  0xfe   : > { %p3733_p7 = por %p3732_p6, %p3731_p3 }
 0x100   : > { %p3734_p9 = pnand %p3733_p7, %p3727_p8 }
 0x102   : > { %3737 = shalt.err (!%p3734_p9)
}
 0x103   : > { %s3738_s7 = scalar_lea.vmem %s502_s2, 128  ;;  %s3886_s15 = smov [#allocation8]  }
 0x104   : > { %p3739_p11 = scmp.ne.s32.totalorder %s502_s2, %s3738_s7  ;;  %s3743_s17 = sshll.u32 %s3886_s15, 4  ;;  %s3744_s17 = int_to_ptr.vmem [resolvable:$false] %s3743_s17 }
 0x105   : > { %s3745_s26 = scalar_lea.vmem %s3744_s17, 256  ;;  %p3746_p4 = scmp.lt.s32.totalorder %s502_s2, %s3744_s17 }
 0x106   : > { %p3741_p10 = pnand %p3739_p11, %p3695_p2  ;;  %p3747_p0 = scmp.lt.s32.totalorder %s3745_s26, %s3738_s7 }
 0x108   : > { %p3742_p12 = pneg %p3741_p10  ;;  %p3748_p1 = por %p3747_p0, %p3746_p4 }
 0x10a   : > { %p3749_p13 = pnand %p3748_p1, %p3742_p12 }
 0x10c   : > { %3752 = shalt.err (!%p3749_p13)
}
 0x10d   : > { %3337 = dma.hbm_to_vmem [thread:$0]  (!%p4241_p5), %s4282_s28, 128, %s502_s2, %s491_s8  }
 0x10e   : > { %p4736_p8 = scmp.ne.s32.totalorder %s4718_s23, 0 }
 0x10f   : > { %s4310_s11 = sand.u32 (!%p4736_p8), 1, %s3865_s1   ;;  %p4737_p0 = scmp.ne.s32.totalorder (!%p4736_p8), %s4728_s14, 0 }
 0x110   : > { %510 = sbr.rel (%p4736_p8) target bundleno = 3446 (0xd76), region = 68  ;;  %s2897_s25 = sshll.u32 (!%p4736_p8), %s4310_s11, 4 }
 0x111   : > { %s513_s30 = scalar_lea.sflag (!%p4736_p8), [#allocation6], %s4310_s11  ;;  %s4316_s6 = scalar_lea.vmem (!%p4736_p8), [#allocation5], %s2897_s25 }
 0x117   : > { %3828 = dma.done.wait (%p4737_p0), %s513_s30, 256  }
 0x118   : > { %3830 = vsyncadd (%p4737_p0), %s513_s30, 4294967040  ;;  %s521_s2 = sand.u32 1, %s4024_s22   ;;  %s2898_s8 = sshll.u32 %s4310_s11, 3 }
 0x119   : > { %s522_s23 = scalar_lea.sflag [#allocation9], %s521_s2  ;;  %s4326_s10 = scalar_lea.vmem [#allocation8], %s2898_s8 }
 0x11a   : > { %3832 = dma.done.wait (%p4737_p0), %s522_s23, 128  }
 0x11b   : > { %3834 = vsyncadd (%p4737_p0), %s522_s23, 4294967168  ;;  %p4738_p5 = scmp.eq.s32.totalorder %s4024_s22, 0 }
 0x11d   : > { %3836 = dma.done.wait (%p4738_p5), [#allocation9], 512   ;;  %p4739_p2 = pmov %p4738_p5 }
 0x11f   : > { %3838 = vsyncadd (%p4739_p2), [#allocation9], 4294966784  ;;  %p4740_p3 = pmov %p4739_p2 }
 0x120   : > { %p4741_p6 = pmov %p4739_p2 }
 0x121   : > { %3840 = dma.done.wait (%p4740_p3), [#allocation12], 528  }
 0x122   : > { %3842 = vsyncadd (%p4741_p6), [#allocation12], 4294966768  ;;  %p4742_p7 = pmov %p4739_p2 }
 0x123   : > { %p4743_p9 = pmov %p4739_p2 }
 0x124   : > { %3844 = dma.done.wait (%p4742_p7), [#allocation15], 1024  }
 0x125   : > { %3846 = vsyncadd (%p4743_p9), [#allocation15], 4294966272  ;;  %p4744_p11 = pmov %p4739_p2 }
 0x126   : > { %p4745_p10 = pmov %p4739_p2 }
 0x127   : > { %3848 = dma.done.wait (%p4744_p11), [#allocation18], 512  }
 0x128   : > { %3850 = vsyncadd (%p4745_p10), [#allocation18], 4294966784  ;;  %v3887_v0 = vmov 0.0|0.0   ;;  %vm3888_vm0 = vmmov 0   ;;  %v3889_v1 = vmov 0.0   ;;  %vm618_vm1 = vcmask 261120  }
 0x129   : > { %3216 = vmatprep.subr.bf16.mxu1 %v3887_v0  ;;  %3065 = vmatprep.mubr.msk.f32.mxu1 %vm3888_vm0, %v3889_v1  ;;  %v607_v2 = vld [vmem:[#allocation10] sm:$0xff]  ;;  %v608_v3 = vld [vmem:[#allocation10 + $0x8] sm:$0xff]  ;;  %v609_v4 = vld [vmem:[#allocation10 + $0x10] sm:$0xff]  ;;  %s603_s14 = sld [smem:[#allocation4 + %s4024_s22]]  ;;  %v784_v17 = vlaneseq  ;;  %vm807_vm5 = vcmask 64512   ;;  %s3890_s16 = smov 96  }
 0x12a   : > { %v3208_v5 = vpack.c.bf16 %v608_v3, %v607_v2  ;;  %v610_v6 = vld [vmem:[#allocation10 + $0x18] sm:$0xff]  ;;  %v4352_v7 = vld [vmem:[%s4316_s6] sm:$0xff]  ;;  %v701_v10 = vld [vmem:[#allocation11 + $0x8] sm:$0xff]  ;;  %s602_s28 = sld [smem:[#allocation3 + %s4024_s22]]  ;;  %v3891_v41 = vmov -1e+30  }
 0x12b   : > { %v3212_v8 = vpack.c.bf16 %v610_v6, %v609_v4  ;;  %3054 = vmatprep.mubr.msk.f32.mxu0 %vm618_vm1, %v4352_v7  ;;  %v700_v9 = vld [vmem:[#allocation11] sm:$0xff]  ;;  %v702_v11 = vld [vmem:[#allocation11 + $0x10] sm:$0xff]  ;;  %v703_v13 = vld [vmem:[#allocation11 + $0x18] sm:$0xff]  ;;  %v796_v18 = vand.u32 127, %v784_v17  ;;  %v785_v21 = vshrl.u32 %v784_v17, 7  ;;  %vm1080_vm9 = vcmask 130048  }
 0x12c   : > { %3209 = vmatprep.subr.bf16.mxu0 %v3208_v5  ;;  %v3217_v12 = vpack.c.bf16 %v701_v10, %v700_v9  ;;  %v3220_v14 = vpack.c.bf16 %v703_v13, %v702_v11  ;;  %v4358_v15 = vld [vmem:[%s4316_s6 + $0x8] sm:$0xff]  ;;  %v4361_v16 = vld [vmem:[%s4326_s10] sm:$0xff]  ;;  %v2910_v24 = vld [vmem:[#allocation13] ss:$0 sm:$0xff]  ;;  %s3892_s20 = smov 64   ;;  %s3893_s21 = smov 120  }
 0x12d   : > { %3211 = vmatpush3.bf16.msra.mxu0 %v3208_v5  ;;  %v2907_v23 = vld [vmem:[%s4686_s5] ss:$0 sm:$0xff]  ;;  %v786_v26 = vadd.s32 8, %v785_v21  ;;  %vm4393_vm7 = vmpackc.low %vm807_vm5, %vm807_vm5  ;;  %s3894_s7 = smov 88   ;;  %s3895_s15 = smov 56   ;;  %vm2312_vm10 = vcmask 195584  }
 0x12e   : > { %3213 = vmatprep.subr.bf16.mxu0 %v3212_v8  ;;  %3218 = vmatpush3.bf16.msra.mxu1 %v3217_v12  ;;  %s3896_s17 = smov 112   ;;  %s3897_s26 = smov 80  }
 0x12f   : > { %3219 = vmatprep.subr.bf16.mxu1 %v3887_v0  ;;  %v790_v19 = vstv %s603_s14  ;;  %s3898_s30 = smov 48   ;;  %s3899_s6 = smov 104  }
 0x130   : > { %vm4368_vm2 = vcmp.lt.s32.totalorder %v796_v18, %v790_v19  ;;  %v787_v22 = vstv %s602_s28  ;;  %vm791_vm4 = vcmp.lt.s32.totalorder %v785_v21, %v790_v19  ;;  %s3900_s2 = smov 72   ;;  %s3901_s23 = smov 40  }
 0x131   : > { %3215 = vmatpush3.bf16.msra.mxu0 %v3212_v8  ;;  %vm788_vm3 = vcmp.lt.s32.totalorder %v785_v21, %v787_v22  ;;  %vm789_vm6 = vcmp.lt.s32.totalorder %v786_v26, %v787_v22  ;;  %v4407_v42 = vsel %vm4368_vm2, 0.0, %v3891_v41  ;;  %vm799_vm8 = vcmp.lt.s32.totalorder %v796_v18, %v787_v22  ;;  %s3902_s10 = smov 8   ;;  %s3903_s14 = smov 16  }
 0x132   : > { %3221 = vmatpush3.bf16.msra.mxu1 %v3220_v14  ;;  %v4413_v52 = vsel %vm799_vm8, 0.0, %v3891_v41  ;;  %s4750_s9 = sld [smem:[#allocation36_spill]]  ;;  %s2964_s28 = sshll.u32 %s4024_s22, 8 }
 0x133   : > { %p4755_p4 = scmp.ne.s32.totalorder %s4729_s27, 0 }
 0x134   : > { %3055 = vmatmul.mubr.msk.f32.vlgmr.msra.gmra.mrb[0].mxu0 %vm618_vm1, %v4358_v15 }
 0x135   : > { %3066 = vmatmul.mubr.msk.f32.vlgmr.msra.gmra.mrb[0].mxu1 %vm618_vm1, %v4361_v16 }
 0x207   : > { %v3056_v25 = vpop.f32.mrb[0].mxu0 }
 0x208   : > { %v691_v27 = vpop.f32.mrb[1].mxu0  ;;  %v780_v28 = vpop.f32.mrb[0].mxu1  ;;  %v697_v32 = vadd.f32 %v3056_v25, %v2907_v23 }
 0x209   : > { %v692_v29 = vadd.f32 %v2907_v23, %v691_v27  ;;  %v781_v30 = vadd.f32 %v2910_v24, %v780_v28  ;;  %v3067_v31 = vpop.f32.mrb[1].mxu1 }
 0x20a   : > { %v4386_v35 = vsel %vm789_vm6, %v697_v32, 0.0 }
 0x20b   : > { %v4376_v33 = vsel %vm788_vm3, %v692_v29, 0.0  ;;  %v4378_v34 = vsel %vm791_vm4, %v781_v30, 0.0 }
 0x20c   : > { %803 = vrot.lane.b32.xlu0 %v4376_v33, %s3890_s16  ;;  %1000 = vrot.lane.b32.xlu1 %v4378_v34, %s3890_s16  ;;  %v3223_v39 = vpack.c.bf16 %v4386_v35, %v4376_v33  ;;  %v4419_v57 = vpack.i.bf16 %v4386_v35, %v4376_v33 }
 0x20d   : > { %3068 = vmatprep.subr.msk.mxu0 %vm807_vm5, %v4378_v34 }
 0x20e   : > { %3069 = vmatpush3.xpose.msk.msra.mxu0 %vm807_vm5, %v4378_v34 }
 0x20f   : > { %3222 = vmatprep.subr.bf16.mxu0 %v3887_v0 }
 0x210   : > { %805 = vrot.lane.b32.xlu0 %v4386_v35, %s3890_s16 }
 0x27e   : > { %v804_v36 = vpop.permute.xlu0 %803  ;;  %v1001_v40 = vpop.permute.xlu1 %1000 }
 0x27f   : > { %3070 = vmatprep.mubr.msk.f32.mxu0 %vm807_vm5, %v804_v36 }
 0x282   : > { %v806_v38 = vpop.permute.xlu0 %805 }
 0x283   : > { %3071 = vmatmul.mubr.msk.f32.vlgmr.msra.gmra.mrb[2].mxu0 %vm807_vm5, %v806_v38 }
 0x284   : > { %3225 = vmatpush3.bf16.xpose.msk.msra.mxu0 %vm4393_vm7, %v3223_v39  ;;  %3082 = vmatprep.mubr.msk.f32.mxu0 %vm3888_vm0, %v3889_v1 }
 0x28b   : > { %3083 = vmatmul.mubr.msk.f32.vlgmr.msra.gmra.mrb[4].mxu0 %vm807_vm5, %v1001_v40 }
 0x356   : > { %v3072_v43 = vpop.f32.mrb[2].mxu0 }
 0x357   : > { %v891_v44 = vmul.f32 0.35355338, %v3072_v43  ;;  %v881_v45 = vpop.f32.mrb[3].mxu0 }
 0x358   : > { %v890_v46 = vmul.f32 0.35355338, %v881_v45 }
 0x359   : > { %v893_v47 = vadd.f32 %v891_v44, %v4407_v42 }
 0x35a   : > { %v892_v48 = vadd.f32 %v890_v46, %v4407_v42 }
 0x35b   : > { %v897_v49 = vsel %vm807_vm5, %v893_v47, -inf }
 0x35c   : > { %898 = vmax.xlane.f32.xlu0 %v897_v49  ;;  %v894_v50 = vsel %vm807_vm5, %v892_v48, -inf }
 0x35d   : > { %895 = vmax.xlane.f32.xlu1 %v894_v50 }
 0x35e   : > { %v1074_v51 = vpop.f32.mrb[4].mxu0 }
 0x35f   : > { %v1078_v53 = vmul.f32 0.35355338, %v1074_v51  ;;  %v3084_v54 = vpop.f32.mrb[5].mxu0 }
 0x361   : > { %v1079_v55 = vadd.f32 %v1078_v53, %v4413_v52 }
 0x363   : > { %v1081_v56 = vsel %vm1080_vm9, %v1079_v55, -inf }
 0x364   : > { %1082 = vmax.xlane.f32.xlu0 %v1081_v56 }
 0x36e   : > { %3421 = vrot.lane.b32.xlu1 %v4419_v57, %s3892_s20 }
 0x372   : > { %1175 = vrot.lane.b32.xlu1 %v4378_v34, %s3893_s21 }
 0x3e9   : > { %v899_v58 = vpop.xlane.xlu0 %898 }
 0x3ea   : > { %v901_v59 = vsub.f32 %v893_v47, %v899_v58  ;;  %v896_v60 = vpop.xlane.xlu1 %895 }
 0x3eb   : > { %v900_v61 = vsub.f32 %v892_v48, %v896_v60 }
 0x3ec   : > { %v904_v62 = vmul.f32 1.442695, %v901_v59 }
 0x3ed   : > { %v902_v63 = vmul.f32 1.442695, %v900_v61 }
 0x3ee   : > { %3455 = vpow2.f32 %v904_v62  ;;  %v3422_v12 = vpop.permute.xlu1 %3421 }
 0x3ef   : > { %3457 = vpow2.f32 %v902_v63  ;;  %v3424_v21 = vunpack.i.h.bf16 %v3422_v12  ;;  %v3423_v22 = vunpack.i.l.bf16 %v3422_v12 }
 0x3f1   : > { %v1083_v2 = vpop.xlane.xlu0 %1082  ;;  %v3227_v26 = vpack.c.bf16 %v3424_v21, %v3423_v22 }
 0x3f2   : > { %v1084_v3 = vsub.f32 %v1079_v55, %v1083_v2  ;;  %v1176_v13 = vpop.permute.xlu1 %1175 }
 0x3f4   : > { %v1085_v4 = vmul.f32 1.442695, %v1084_v3 }
 0x3f6   : > { %3459 = vpow2.f32 %v1085_v4 }
 0x3f8   : > { %v3456_v5 = vpop.eup %3455 }
 0x3f9   : > { %v3458_v6 = vpop.eup %3457  ;;  %v909_v8 = vsel %vm807_vm5, %v3456_v5, 0.0 }
 0x3fa   : > { %910 = vadd.xlane.f32.xlu0 %v909_v8  ;;  %v906_v9 = vsel %vm807_vm5, %v3458_v6, 0.0 }
 0x3fb   : > { %907 = vadd.xlane.f32.xlu1 %v906_v9 }
 0x400   : > { %v3460_v10 = vpop.eup %3459 }
 0x401   : > { %v1087_v11 = vsel %vm1080_vm9, %v3460_v10, 0.0 }
 0x402   : > { %1088 = vadd.xlane.f32.xlu1 %v1087_v11 }
 0x410   : > { %916 = vrot.lane.b32.xlu0 %v4378_v34, %s3892_s20  ;;  %s4752_s20 = sld [smem:[#allocation39_spill]] }
 0x413   : > { %1173 = vrot.lane.b32.xlu1 %v4386_v35, %s3894_s7 }
 0x414   : > { %1171 = vrot.lane.b32.xlu0 %v4376_v33, %s3894_s7 }
 0x417   : > { %1368 = vrot.lane.b32.xlu1 %v4378_v34, %s3894_s7 }
 0x418   : > { %3426 = vrot.lane.b32.xlu0 %v4419_v57, %s3893_s21  ;;  %s4601_s21 = scalar_lea.vmem [#allocation20], %s2898_s8  ;;  %s2666_s8 = scalar_lea.sflag [#allocation7], %s4310_s11 }
 0x419   : > { %s2700_s7 = sshll.u32 %s4601_s21, 4  ;;  %s4614_s7 = int_to_ptr.vmem [resolvable:$true] %s2700_s7 }
 0x487   : > { %v911_v14 = vpop.xlane.xlu0 %910 }
 0x488   : > { %3461 = vrcp.f32 %v911_v14  ;;  %v908_v17 = vpop.xlane.xlu1 %907 }
 0x489   : > { %3463 = vrcp.f32 %v908_v17 }
 0x48b   : > { %v917_v18 = vpop.permute.xlu0 %916 }
 0x48c   : > { %3073 = vmatprep.subr.mxu1 %v917_v18 }
 0x48d   : > { %3074 = vmatpush3.msra.mxu1 %v917_v18 }
 0x48e   : > { %3226 = vmatprep.subr.bf16.mxu1 %v3887_v0 }
 0x48f   : > { %v1089_v19 = vpop.xlane.xlu1 %1088  ;;  %v1172_v27 = vpop.permute.xlu0 %1171 }
 0x490   : > { %3465 = vrcp.f32 %v1089_v19 }
 0x492   : > { %v3462_v20 = vpop.eup %3461 }
 0x493   : > { %v3464_v23 = vpop.eup %3463  ;;  %v915_v25 = vmul.f32 %v3462_v20, %v3456_v5  ;;  %v3427_v30 = vpop.permute.xlu0 %3426 }
 0x494   : > { %v914_v24 = vmul.f32 %v3464_v23, %v3458_v6  ;;  %v3429_v31 = vunpack.i.h.bf16 %v3427_v30  ;;  %v3428_v32 = vunpack.i.l.bf16 %v3427_v30  ;;  %v1174_v36 = vpop.permute.xlu1 %1173 }
 0x496   : > { %3075 = vmatprep.mubr.msk.f32.mxu1 %vm807_vm5, %v914_v24  ;;  %v3230_v38 = vpack.c.bf16 %v3429_v31, %v3428_v32 }
 0x497   : > { %3076 = vmatmul.mubr.msk.f32.vlgmr.msra.gmra.mrb[2].mxu1 %vm807_vm5, %v915_v25 }
 0x498   : > { %3228 = vmatpush3.bf16.msra.mxu1 %v3227_v26  ;;  %3089 = vmatprep.mubr.msk.f32.mxu1 %vm3888_vm0, %v3889_v1  ;;  %v1369_v39 = vpop.permute.xlu1 %1368 }
 0x499   : > { %3092 = vmatprep.subr.msk.mxu1 %vm807_vm5, %v1176_v13 }
 0x49a   : > { %v3466_v28 = vpop.eup %3465 }
 0x49b   : > { %v1091_v29 = vmul.f32 %v3466_v28, %v3460_v10 }
 0x49d   : > { %3090 = vmatmul.mubr.msk.f32.vlgmr.msra.gmra.mrb[4].mxu1 %vm1080_vm9, %v1091_v29 }
 0x49e   : > { %3094 = vmatprep.mubr.msk.f32.mxu1 %vm807_vm5, %v1172_v27 }
 0x4a1   : > { %3093 = vmatpush3.xpose.msk.msra.mxu1 %vm807_vm5, %v1176_v13 }
 0x4a2   : > { %3229 = vmatprep.subr.bf16.mxu1 %v3887_v0 }
 0x4a4   : > { %3095 = vmatmul.mubr.msk.f32.vlgmr.msra.gmra.mrb[6].mxu1 %vm807_vm5, %v1174_v36 }
 0x4a5   : > { %3232 = vmatpush3.bf16.xpose.msk.msra.mxu1 %vm4393_vm7, %v3230_v38  ;;  %3106 = vmatprep.mubr.msk.f32.mxu1 %vm3888_vm0, %v3889_v1 }
 0x4ac   : > { %3107 = vmatmul.mubr.msk.f32.vlgmr.msra.gmra.mrb[8].mxu1 %vm807_vm5, %v1369_v39 }
 0x56a   : > { %v4447_v40 = vpop.f32.mrb[2].mxu1 }
 0x56b   : > { %v4449_v41 = vpop.f32.mrb[3].mxu1 }
 0x570   : > { %v4451_v43 = vpop.f32.mrb[4].mxu1 }
 0x571   : > { %v3091_v44 = vpop.f32.mrb[5].mxu1 }
 0x577   : > { %v3096_v45 = vpop.f32.mrb[6].mxu1 }
 0x578   : > { %v1259_v46 = vmul.f32 0.35355338, %v3096_v45  ;;  %v1249_v47 = vpop.f32.mrb[7].mxu1 }
 0x579   : > { %v1258_v48 = vmul.f32 0.35355338, %v1249_v47 }
 0x57a   : > { %v1261_v49 = vadd.f32 %v1259_v46, %v4407_v42 }
 0x57b   : > { %v1260_v50 = vadd.f32 %v1258_v48, %v4407_v42 }
 0x57c   : > { %v1265_v51 = vsel %vm807_vm5, %v1261_v49, -inf }
 0x57d   : > { %1266 = vmax.xlane.f32.xlu1 %v1265_v51  ;;  %v1262_v53 = vsel %vm807_vm5, %v1260_v50, -inf }
 0x57e   : > { %1263 = vmax.xlane.f32.xlu0 %v1262_v53 }
 0x57f   : > { %v1446_v54 = vpop.f32.mrb[8].mxu1 }
 0x580   : > { %v1450_v55 = vmul.f32 0.35355338, %v1446_v54  ;;  %v3108_v56 = vpop.f32.mrb[9].mxu1 }
 0x582   : > { %v1451_v58 = vadd.f32 %v1450_v55, %v4413_v52 }
 0x584   : > { %v1452_v59 = vsel %vm1080_vm9, %v1451_v58, -inf }
 0x585   : > { %1453 = vmax.xlane.f32.xlu0 %v1452_v59 }
 0x58e   : > { %1284 = vrot.lane.b32.xlu1 %v4378_v34, %s3895_s15 }
 0x60a   : > { %v1267_v60 = vpop.xlane.xlu1 %1266 }
 0x60b   : > { %v1269_v61 = vsub.f32 %v1261_v49, %v1267_v60  ;;  %v1264_v62 = vpop.xlane.xlu0 %1263 }
 0x60c   : > { %v1268_v63 = vsub.f32 %v1260_v50, %v1264_v62 }
 0x60d   : > { %v1272_v2 = vmul.f32 1.442695, %v1269_v61 }
 0x60e   : > { %v1270_v3 = vmul.f32 1.442695, %v1268_v63  ;;  %v1285_v4 = vpop.permute.xlu1 %1284 }
 0x60f   : > { %3467 = vpow2.f32 %v1272_v2  ;;  %3097 = vmatprep.subr.mxu0 %v1285_v4 }
 0x610   : > { %3469 = vpow2.f32 %v1270_v3  ;;  %3098 = vmatpush3.msra.mxu0 %v1285_v4 }
 0x611   : > { %3233 = vmatprep.subr.bf16.mxu0 %v3887_v0 }
 0x612   : > { %v1454_v10 = vpop.xlane.xlu0 %1453 }
 0x613   : > { %v1455_v11 = vsub.f32 %v1451_v58, %v1454_v10 }
 0x615   : > { %v1456_v12 = vmul.f32 1.442695, %v1455_v11 }
 0x617   : > { %3471 = vpow2.f32 %v1456_v12 }
 0x619   : > { %v3468_v5 = vpop.eup %3467 }
 0x61a   : > { %v3470_v6 = vpop.eup %3469  ;;  %v1277_v8 = vsel %vm807_vm5, %v3468_v5, 0.0 }
 0x61b   : > { %1278 = vadd.xlane.f32.xlu1 %v1277_v8  ;;  %v1274_v9 = vsel %vm807_vm5, %v3470_v6, 0.0 }
 0x61c   : > { %1275 = vadd.xlane.f32.xlu0 %v1274_v9 }
 0x621   : > { %v3472_v13 = vpop.eup %3471 }
 0x622   : > { %v1458_v14 = vsel %vm1080_vm9, %v3472_v13, 0.0 }
 0x62c   : > { %1546 = vrot.lane.b32.xlu1 %v4378_v34, %s3896_s17 }
 0x630   : > { %1542 = vrot.lane.b32.xlu1 %v4376_v33, %s3897_s26 }
 0x632   : > { %3431 = vrot.lane.b32.xlu0 %v4419_v57, %s3895_s15 }
 0x634   : > { %3436 = vrot.lane.b32.xlu1 %v4419_v57, %s3896_s17 }
 0x651   : > { %1459 = vadd.xlane.f32.xlu0 %v1458_v14 }
 0x667   : > { %1544 = vrot.lane.b32.xlu0 %v4386_v35, %s3897_s26 }
 0x66b   : > { %1739 = vrot.lane.b32.xlu0 %v4378_v34, %s3897_s26  ;;  %s3904_s26 = smov 24  }
 0x6a8   : > { %v1279_v17 = vpop.xlane.xlu1 %1278 }
 0x6a9   : > { %3473 = vrcp.f32 %v1279_v17  ;;  %v1276_v18 = vpop.xlane.xlu0 %1275 }
 0x6aa   : > { %3475 = vrcp.f32 %v1276_v18 }
 0x6ac   : > { %v1547_v27 = vpop.permute.xlu1 %1546 }
 0x6ad   : > { %v3432_v19 = vpop.permute.xlu0 %3431 }
 0x6ae   : > { %v3434_v21 = vunpack.i.h.bf16 %v3432_v19  ;;  %v3433_v22 = vunpack.i.l.bf16 %v3432_v19 }
 0x6b0   : > { %v3234_v26 = vpack.c.bf16 %v3434_v21, %v3433_v22  ;;  %v1543_v29 = vpop.permute.xlu1 %1542 }
 0x6b3   : > { %v3474_v20 = vpop.eup %3473 }
 0x6b4   : > { %v3476_v23 = vpop.eup %3475  ;;  %v1283_v25 = vmul.f32 %v3474_v20, %v3468_v5  ;;  %v3437_v30 = vpop.permute.xlu1 %3436 }
 0x6b5   : > { %v1282_v24 = vmul.f32 %v3476_v23, %v3470_v6  ;;  %v3439_v36 = vunpack.i.h.bf16 %v3437_v30  ;;  %v3438_v38 = vunpack.i.l.bf16 %v3437_v30 }
 0x6b7   : > { %3099 = vmatprep.mubr.msk.f32.mxu0 %vm807_vm5, %v1282_v24  ;;  %v3237_v39 = vpack.c.bf16 %v3439_v36, %v3438_v38 }
 0x6b8   : > { %3100 = vmatmul.mubr.msk.f32.vlgmr.msra.gmra.mrb[6].mxu0 %vm807_vm5, %v1283_v25 }
 0x6b9   : > { %3235 = vmatpush3.bf16.msra.mxu0 %v3234_v26  ;;  %3113 = vmatprep.mubr.msk.f32.mxu0 %vm3888_vm0, %v3889_v1 }
 0x6ba   : > { %3116 = vmatprep.subr.msk.mxu0 %vm807_vm5, %v1547_v27 }
 0x6de   : > { %v1460_v28 = vpop.xlane.xlu0 %1459 }
 0x6df   : > { %3477 = vrcp.f32 %v1460_v28 }
 0x6e2   : > { %v1545_v44 = vpop.permute.xlu0 %1544 }
 0x6e6   : > { %v1740_v45 = vpop.permute.xlu0 %1739 }
 0x6e9   : > { %v3478_v31 = vpop.eup %3477 }
 0x6ea   : > { %v1462_v32 = vmul.f32 %v3478_v31, %v3472_v13 }
 0x6ec   : > { %3114 = vmatmul.mubr.msk.f32.vlgmr.msra.gmra.mrb[8].mxu0 %vm1080_vm9, %v1462_v32 }
 0x6ed   : > { %3117 = vmatpush3.xpose.msk.msra.mxu0 %vm807_vm5, %v1547_v27  ;;  %3118 = vmatprep.mubr.msk.f32.mxu0 %vm807_vm5, %v1543_v29 }
 0x6ee   : > { %3236 = vmatprep.subr.bf16.mxu0 %v3887_v0 }
 0x6f0   : > { %3119 = vmatmul.mubr.msk.f32.vlgmr.msra.gmra.mrb[10].mxu0 %vm807_vm5, %v1545_v44 }
 0x6f1   : > { %3239 = vmatpush3.bf16.xpose.msk.msra.mxu0 %vm4393_vm7, %v3237_v39  ;;  %3130 = vmatprep.mubr.msk.f32.mxu0 %vm3888_vm0, %v3889_v1 }
 0x6f8   : > { %3131 = vmatmul.mubr.msk.f32.vlgmr.msra.gmra.mrb[12].mxu0 %vm807_vm5, %v1740_v45 }
 0x78b   : > { %v4485_v46 = vpop.f32.mrb[6].mxu0 }
 0x78c   : > { %v4487_v47 = vpop.f32.mrb[7].mxu0 }
 0x7bf   : > { %v4489_v48 = vpop.f32.mrb[8].mxu0 }
 0x7c0   : > { %v3115_v49 = vpop.f32.mrb[9].mxu0 }
 0x7c3   : > { %v3120_v50 = vpop.f32.mrb[10].mxu0 }
 0x7c4   : > { %v1630_v51 = vmul.f32 0.35355338, %v3120_v50  ;;  %v1620_v53 = vpop.f32.mrb[11].mxu0 }
 0x7c5   : > { %v1629_v54 = vmul.f32 0.35355338, %v1620_v53 }
 0x7c6   : > { %v1632_v55 = vadd.f32 %v1630_v51, %v4407_v42 }
 0x7c7   : > { %v1631_v56 = vadd.f32 %v1629_v54, %v4407_v42 }
 0x7c8   : > { %v1636_v58 = vsel %vm807_vm5, %v1632_v55, -inf }
 0x7c9   : > { %1637 = vmax.xlane.f32.xlu0 %v1636_v58  ;;  %v1633_v59 = vsel %vm807_vm5, %v1631_v56, -inf }
 0x7ca   : > { %1634 = vmax.xlane.f32.xlu1 %v1633_v59 }
 0x7cb   : > { %v1817_v60 = vpop.f32.mrb[12].mxu0 }
 0x7cc   : > { %v1821_v61 = vmul.f32 0.35355338, %v1817_v60  ;;  %v3132_v62 = vpop.f32.mrb[13].mxu0 }
 0x7ce   : > { %v1822_v63 = vadd.f32 %v1821_v61, %v4413_v52 }
 0x7d0   : > { %v1823_v2 = vsel %vm1080_vm9, %v1822_v63, -inf }
 0x7d1   : > { %1824 = vmax.xlane.f32.xlu0 %v1823_v2 }
 0x7db   : > { %3441 = vrot.lane.b32.xlu1 %v4419_v57, %s3898_s30 }
 0x7df   : > { %1917 = vrot.lane.b32.xlu1 %v4378_v34, %s3899_s6 }
 0x856   : > { %v1638_v3 = vpop.xlane.xlu0 %1637 }
 0x857   : > { %v1640_v4 = vsub.f32 %v1632_v55, %v1638_v3  ;;  %v1635_v5 = vpop.xlane.xlu1 %1634 }
 0x858   : > { %v1639_v6 = vsub.f32 %v1631_v56, %v1635_v5 }
 0x859   : > { %v1643_v8 = vmul.f32 1.442695, %v1640_v4 }
 0x85a   : > { %v1641_v9 = vmul.f32 1.442695, %v1639_v6 }
 0x85b   : > { %3479 = vpow2.f32 %v1643_v8  ;;  %v3442_v21 = vpop.permute.xlu1 %3441 }
 0x85c   : > { %3481 = vpow2.f32 %v1641_v9  ;;  %v3444_v27 = vunpack.i.h.bf16 %v3442_v21  ;;  %v3443_v28 = vunpack.i.l.bf16 %v3442_v21 }
 0x85e   : > { %v1825_v10 = vpop.xlane.xlu0 %1824 }
 0x85f   : > { %v1826_v11 = vsub.f32 %v1822_v63, %v1825_v10  ;;  %v1918_v22 = vpop.permute.xlu1 %1917 }
 0x861   : > { %v1827_v12 = vmul.f32 1.442695, %v1826_v11 }
 0x863   : > { %3483 = vpow2.f32 %v1827_v12 }
 0x865   : > { %v3480_v13 = vpop.eup %3479 }
 0x866   : > { %v3482_v14 = vpop.eup %3481  ;;  %v1648_v17 = vsel %vm807_vm5, %v3480_v13, 0.0 }
 0x867   : > { %1649 = vadd.xlane.f32.xlu0 %v1648_v17  ;;  %v1645_v18 = vsel %vm807_vm5, %v3482_v14, 0.0 }
 0x868   : > { %1646 = vadd.xlane.f32.xlu1 %v1645_v18 }
 0x86d   : > { %v3484_v19 = vpop.eup %3483 }
 0x86e   : > { %v1829_v20 = vsel %vm1080_vm9, %v3484_v19, 0.0 }
 0x86f   : > { %1830 = vadd.xlane.f32.xlu1 %v1829_v20 }
 0x87d   : > { %1655 = vrot.lane.b32.xlu0 %v4378_v34, %s3898_s30  ;;  %s594_s30 = scalar_lea.vmem [#allocation19], %s2897_s25  ;;  %s2960_s25 = sshll.u32 %s4024_s22, 7 }
 0x87e   : > { %s4754_s22 = sld [smem:[#allocation41_spill]] }
 0x880   : > { %1913 = vrot.lane.b32.xlu1 %v4376_v33, %s3900_s2 }
 0x881   : > { %3446 = vrot.lane.b32.xlu0 %v4419_v57, %s3899_s6  ;;  %s2684_s6 = sshll.u32 %s594_s30, 4  ;;  %s4593_s6 = int_to_ptr.vmem [resolvable:$true] %s2684_s6 }
 0x882   : > { %s3753_s16 = scalar_lea.vmem %s4593_s6, 256 }
 0x883   : > { %p3754_p12 = scmp.ne.s32.totalorder %s4593_s6, %s3753_s16 }
 0x884   : > { %2110 = vrot.lane.b32.xlu1 %v4378_v34, %s3900_s2  ;;  %s4612_s13 = scalar_lea.hbm %s4754_s22, %s2960_s25 }
 0x885   : > { %1915 = vrot.lane.b32.xlu0 %v4386_v35, %s3900_s2  ;;  %v3241_v35 = vpack.c.bf16 %v3444_v27, %v3443_v28  ;;  %p3755_p1 = pnand %p3754_p12, %p4755_p4 }
 0x887   : > { %p3756_p13 = pneg %p3755_p1 }
 0x8f4   : > { %v1650_v23 = vpop.xlane.xlu0 %1649 }
 0x8f5   : > { %3485 = vrcp.f32 %v1650_v23  ;;  %v1647_v24 = vpop.xlane.xlu1 %1646 }
 0x8f6   : > { %3487 = vrcp.f32 %v1647_v24 }
 0x8f8   : > { %v1656_v25 = vpop.permute.xlu0 %1655 }
 0x8f9   : > { %3121 = vmatprep.subr.mxu1 %v1656_v25 }
 0x8fa   : > { %3122 = vmatpush3.msra.mxu1 %v1656_v25 }
 0x8fb   : > { %3240 = vmatprep.subr.bf16.mxu1 %v3887_v0 }
 0x8fc   : > { %v1831_v26 = vpop.xlane.xlu1 %1830  ;;  %v3447_v38 = vpop.permute.xlu0 %3446 }
 0x8fd   : > { %3489 = vrcp.f32 %v1831_v26  ;;  %v3449_v44 = vunpack.i.h.bf16 %v3447_v38  ;;  %v3448_v45 = vunpack.i.l.bf16 %v3447_v38 }
 0x8ff   : > { %v3486_v33 = vpop.eup %3485  ;;  %v3244_v49 = vpack.c.bf16 %v3449_v44, %v3448_v45  ;;  %v2336_v45 = vld [vmem:[%s4750_s9 + $0x10] sm:$0xff] }
 0x900   : > { %v3488_v29 = vpop.eup %3487  ;;  %v1654_v31 = vmul.f32 %v3486_v33, %v3480_v13  ;;  %v1914_v39 = vpop.permute.xlu1 %1913 }
 0x901   : > { %v1653_v30 = vmul.f32 %v3488_v29, %v3482_v14  ;;  %v1916_v50 = vpop.permute.xlu0 %1915 }
 0x903   : > { %3123 = vmatprep.mubr.msk.f32.mxu1 %vm807_vm5, %v1653_v30 }
 0x904   : > { %3124 = vmatmul.mubr.msk.f32.vlgmr.msra.gmra.mrb[10].mxu1 %vm807_vm5, %v1654_v31  ;;  %v2111_v51 = vpop.permute.xlu1 %2110 }
 0x905   : > { %3242 = vmatpush3.bf16.msra.mxu1 %v3241_v35  ;;  %3137 = vmatprep.mubr.msk.f32.mxu1 %vm3888_vm0, %v3889_v1  ;;  %v2334_v35 = vld [vmem:[%s4750_s9] sm:$0xff] }
 0x906   : > { %3140 = vmatprep.subr.msk.mxu1 %vm807_vm5, %v1918_v22 }
 0x907   : > { %v3490_v32 = vpop.eup %3489 }
 0x908   : > { %v1833_v36 = vmul.f32 %v3490_v32, %v3484_v19  ;;  %v2335_v32 = vld [vmem:[%s4750_s9 + $0x8] sm:$0xff] }
 0x909   : > { %v3250_v38 = vpack.c.bf16 %v2335_v32, %v2334_v35 }
 0x90a   : > { %3138 = vmatmul.mubr.msk.f32.vlgmr.msra.gmra.mrb[12].mxu1 %vm1080_vm9, %v1833_v36  ;;  %v2507_v36 = vld [vmem:[#allocation17] sm:$0xff] }
 0x90b   : > { %3142 = vmatprep.mubr.msk.f32.mxu1 %vm807_vm5, %v1914_v39  ;;  %v2508_v39 = vld [vmem:[#allocation17 + $0x8] sm:$0xff] }
 0x90c   : > { %v3267_v44 = vpack.c.bf16 %v2508_v39, %v2507_v36 }
 0x90e   : > { %3141 = vmatpush3.xpose.msk.msra.mxu1 %vm807_vm5, %v1918_v22 }
 0x90f   : > { %3243 = vmatprep.subr.bf16.mxu1 %v3887_v0 }
 0x911   : > { %3143 = vmatmul.mubr.msk.f32.vlgmr.msra.gmra.mrb[14].mxu1 %vm807_vm5, %v1916_v50 }
 0x912   : > { %3246 = vmatpush3.bf16.xpose.msk.msra.mxu1 %vm4393_vm7, %v3244_v49  ;;  %3154 = vmatprep.mubr.msk.f32.mxu1 %vm3888_vm0, %v3889_v1  ;;  %v2337_v49 = vld [vmem:[%s4750_s9 + $0x18] sm:$0xff] }
 0x913   : > { %3266 = vmatprep.subr.bf16.mxu1 %v3887_v0  ;;  %v3254_v50 = vpack.c.bf16 %v2337_v49, %v2336_v45 }
 0x919   : > { %3155 = vmatmul.mubr.msk.f32.vlgmr.msra.gmra.mrb[16].mxu1 %vm807_vm5, %v2111_v51  ;;  %v2509_v51 = vld [vmem:[#allocation17 + $0x10] sm:$0xff] }
 0x91a   : > { %3194 = vmatprep.mubr.msk.f32.mxu1 %vm3888_vm0, %v3889_v1  ;;  %3268 = vmatpush3.bf16.msra.mxu1 %v3267_v44 }
 0x91b   : > { %3269 = vmatprep.subr.bf16.mxu1 %v3887_v0 }
 0x9d7   : > { %v3125_v53 = vpop.f32.mrb[10].mxu1 }
 0x9d8   : > { %v1730_v54 = vpop.f32.mrb[11].mxu1 }
 0x9dd   : > { %v1909_v55 = vpop.f32.mrb[12].mxu1 }
 0x9de   : > { %v3139_v56 = vpop.f32.mrb[13].mxu1 }
 0x9df   : > { %v2331_v56 = vld [vmem:[#allocation14 + $0x8] sm:$0xff] }
 0x9e4   : > { %v3144_v58 = vpop.f32.mrb[14].mxu1 }
 0x9e5   : > { %v2001_v59 = vmul.f32 0.35355338, %v3144_v58  ;;  %v1991_v60 = vpop.f32.mrb[15].mxu1 }
 0x9e6   : > { %v2000_v37 = vmul.f32 0.35355338, %v1991_v60 }
 0x9e7   : > { %v2003_v61 = vadd.f32 %v2001_v59, %v4407_v42 }
 0x9e8   : > { %v2002_v62 = vadd.f32 %v2000_v37, %v4407_v42 }
 0x9e9   : > { %v2007_v63 = vsel %vm807_vm5, %v2003_v61, -inf }
 0x9ea   : > { %2008 = vmax.xlane.f32.xlu1 %v2007_v63  ;;  %v2004_v2 = vsel %vm807_vm5, %v2002_v62, -inf }
 0x9eb   : > { %2005 = vmax.xlane.f32.xlu0 %v2004_v2 }
 0x9ec   : > { %v2188_v3 = vpop.f32.mrb[16].mxu1 }
 0x9ed   : > { %v2192_v4 = vmul.f32 0.35355338, %v2188_v3  ;;  %v3156_v5 = vpop.f32.mrb[17].mxu1 }
 0x9ef   : > { %v2193_v6 = vadd.f32 %v2192_v4, %v4413_v52 }
 0x9f1   : > { %v2194_v8 = vsel %vm1080_vm9, %v2193_v6, -inf }
 0x9f2   : > { %2195 = vmax.xlane.f32.xlu0 %v2194_v8 }
 0xa77   : > { %v2009_v9 = vpop.xlane.xlu1 %2008 }
 0xa78   : > { %v2011_v10 = vsub.f32 %v2003_v61, %v2009_v9  ;;  %v2006_v11 = vpop.xlane.xlu0 %2005  ;;  %v2503_v9 = vld [vmem:[#allocation16] sm:$0xff] }
 0xa79   : > { %v2010_v12 = vsub.f32 %v2002_v62, %v2006_v11 }
 0xa7a   : > { %v2014_v13 = vmul.f32 1.442695, %v2011_v10 }
 0xa7b   : > { %v2012_v42 = vmul.f32 1.442695, %v2010_v12  ;;  %v2504_v12 = vld [vmem:[#allocation16 + $0x8] sm:$0xff] }
 0xa7c   : > { %3491 = vpow2.f32 %v2014_v13  ;;  %v2332_v13 = vld [vmem:[#allocation14 + $0x10] sm:$0xff] }
 0xa7d   : > { %3493 = vpow2.f32 %v2012_v42  ;;  %v2333_v42 = vld [vmem:[#allocation14 + $0x18] sm:$0xff] }
 0xa7f   : > { %v2196_v14 = vpop.xlane.xlu0 %2195 }
 0xa80   : > { %v2197_v17 = vsub.f32 %v2193_v6, %v2196_v14 }
 0xa82   : > { %v2198_v18 = vmul.f32 1.442695, %v2197_v17 }
 0xa84   : > { %3495 = vpow2.f32 %v2198_v18 }
 0xa86   : > { %v3492_v19 = vpop.eup %3491 }
 0xa87   : > { %v3494_v20 = vpop.eup %3493  ;;  %v2019_v21 = vsel %vm807_vm5, %v3492_v19, 0.0 }
 0xa88   : > { %2020 = vadd.xlane.f32.xlu1 %v2019_v21  ;;  %v2016_v52 = vsel %vm807_vm5, %v3494_v20, 0.0 }
 0xa89   : > { %2017 = vadd.xlane.f32.xlu0 %v2016_v52 }
 0xa8e   : > { %v3496_v22 = vpop.eup %3495 }
 0xa8f   : > { %v2200_v23 = vsel %vm1080_vm9, %v3496_v22, 0.0 }
 0xa90   : > { %2201 = vadd.xlane.f32.xlu0 %v2200_v23  ;;  %v2505_v23 = vld [vmem:[#allocation16 + $0x10] sm:$0xff] }
 0xa99   : > { %2026 = vrot.lane.b32.xlu1 %v4378_v34, %s3901_s23 }
 0xa9d   : > { %2286 = vrot.lane.b32.xlu1 %v4487_v47, %s3902_s10 }
 0xaa1   : > { %2288 = vrot.lane.b32.xlu1 %v4485_v46, %s3902_s10 }
 0xaa5   : > { %2316 = vrot.lane.b32.xlu1 %v4489_v48, %s3902_s10 }
 0xaa6   : > { %3451 = vrot.lane.b32.xlu0 %v4419_v57, %s3901_s23 }
 0xaaa   : > { %2294 = vrot.lane.b32.xlu0 %v1730_v54, %s3903_s14 }
 0xaae   : > { %2296 = vrot.lane.b32.xlu0 %v3125_v53, %s3903_s14  ;;  %v2510_v53 = vld [vmem:[#allocation17 + $0x18] sm:$0xff] }
 0xaaf   : > { %v3270_v54 = vpack.c.bf16 %v2510_v53, %v2509_v51 }
 0xab1   : > { %3271 = vmatpush3.bf16.msra.mxu1 %v3270_v54 }
 0xab2   : > { %2320 = vrot.lane.b32.xlu0 %v1909_v55, %s3903_s14  ;;  %v2330_v55 = vld [vmem:[#allocation14] sm:$0xff]  ;;  %3272 = vmatprep.subr.bf16.mxu1 %v3887_v0  ;;  %s4751_s14 = sld [smem:[#allocation37_spill]] }
 0xab3   : > { %v3258_v58 = vpack.c.bf16 %v2331_v56, %v2330_v55 }
 0xb15   : > { %v2021_v24 = vpop.xlane.xlu1 %2020 }
 0xb16   : > { %3497 = vrcp.f32 %v2021_v24  ;;  %v2018_v25 = vpop.xlane.xlu0 %2017  ;;  %v2506_v24 = vld [vmem:[#allocation16 + $0x18] sm:$0xff] }
 0xb17   : > { %3499 = vrcp.f32 %v2018_v25 }
 0xb19   : > { %v2027_v34 = vpop.permute.xlu1 %2026 }
 0xb1a   : > { %3145 = vmatprep.subr.mxu0 %v2027_v34 }
 0xb1b   : > { %3146 = vmatpush3.msra.mxu0 %v2027_v34 }
 0xb1c   : > { %3247 = vmatprep.subr.bf16.mxu0 %v3887_v0 }
 0xb1d   : > { %v2202_v47 = vpop.xlane.xlu0 %2201  ;;  %v2287_v62 = vpop.permute.xlu1 %2286 }
 0xb1e   : > { %3501 = vrcp.f32 %v2202_v47  ;;  %v2308_v5 = vsel %vm807_vm5, %v4449_v41, %v2287_v62 }
 0xb20   : > { %v3498_v46 = vpop.eup %3497 }
 0xb21   : > { %v3500_v26 = vpop.eup %3499  ;;  %v3452_v48 = vpop.permute.xlu0 %3451  ;;  %v2025_v28 = vmul.f32 %v3498_v46, %v3492_v19  ;;  %v3273_v19 = vpack.c.bf16 %v2504_v12, %v2503_v9 }
 0xb22   : > { %v3454_v33 = vunpack.i.h.bf16 %v3452_v48  ;;  %v3453_v57 = vunpack.i.l.bf16 %v3452_v48  ;;  %v2024_v27 = vmul.f32 %v3500_v26, %v3494_v20  ;;  %v2289_v2 = vpop.permute.xlu1 %2288  ;;  %v3262_v20 = vpack.c.bf16 %v2333_v42, %v2332_v13 }
 0xb23   : > { %v2309_v14 = vsel %vm807_vm5, %v4447_v40, %v2289_v2  ;;  %v3276_v40 = vpack.c.bf16 %v2506_v24, %v2505_v23 }
 0xb24   : > { %v3248_v29 = vpack.c.bf16 %v3454_v33, %v3453_v57  ;;  %3147 = vmatprep.mubr.msk.f32.mxu0 %vm807_vm5, %v2024_v27 }
 0xb25   : > { %3148 = vmatmul.mubr.msk.f32.vlgmr.msra.gmra.mrb[14].mxu0 %vm807_vm5, %v2025_v28  ;;  %v2295_v63 = vpop.permute.xlu0 %2294 }
 0xb26   : > { %3249 = vmatpush3.bf16.msra.mxu0 %v3248_v29  ;;  %3161 = vmatprep.mubr.msk.f32.mxu0 %vm3888_vm0, %v3889_v1  ;;  %v2317_v4 = vpop.permute.xlu1 %2316  ;;  %v2310_v6 = vsel %vm1080_vm9, %v2308_v5, %v2295_v63 }
 0xb27   : > { %3251 = vmatprep.subr.bf16.mxu0 %v3250_v38  ;;  %v2327_v17 = vsel %vm807_vm5, %v4451_v43, %v2317_v4 }
 0xb28   : > { %v3502_v30 = vpop.eup %3501 }
 0xb29   : > { %v2204_v31 = vmul.f32 %v3502_v30, %v3496_v22  ;;  %v2297_v3 = vpop.permute.xlu0 %2296 }
 0xb2a   : > { %v2311_v41 = vsel %vm1080_vm9, %v2309_v14, %v2297_v3 }
 0xb2b   : > { %3162 = vmatmul.mubr.msk.f32.vlgmr.msra.gmra.mrb[16].mxu0 %vm1080_vm9, %v2204_v31 }
 0xb2c   : > { %3253 = vmatpush3.bf16.msra.mxu0 %v3250_v38 }
 0xb2d   : > { %3255 = vmatprep.subr.bf16.mxu0 %v3254_v50  ;;  %v2321_v10 = vpop.permute.xlu0 %2320 }
 0xb2e   : > { %v2328_v21 = vsel %vm1080_vm9, %v2327_v17, %v2321_v10 }
 0xb30   : > { %3257 = vmatpush3.bf16.msra.mxu0 %v3254_v50 }
 0xb31   : > { %3259 = vmatprep.subr.bf16.mxu0 %v3258_v58 }
 0xbf8   : > { %v3149_v59 = vpop.f32.mrb[14].mxu0 }
 0xbf9   : > { %v2101_v60 = vpop.f32.mrb[15].mxu0 }
 0xbfa   : > { %2302 = vrot.lane.b32.xlu1 %v2101_v60, %s3904_s26 }
 0xbfe   : > { %2304 = vrot.lane.b32.xlu1 %v3149_v59, %s3904_s26  ;;  %v2280_v37 = vpop.f32.mrb[16].mxu0 }
 0xbff   : > { %2324 = vrot.lane.b32.xlu0 %v2280_v37, %s3904_s26  ;;  %v3163_v61 = vpop.f32.mrb[17].mxu0  ;;  %s4753_s26 = sld [smem:[#allocation40_spill]] }
 0xc05   : > { %s4607_s2 = scalar_lea.hbm %s4753_s26, %s2964_s28 }
 0xc6c   : > { %v2303_v8 = vpop.permute.xlu1 %2302 }
 0xc6d   : > { %v2313_v11 = vsel %vm2312_vm10, %v2310_v6, %v2303_v8 }
 0xc6e   : > { %3172 = vmatprep.mubr.msk.f32.mxu0 %vm618_vm1, %v2313_v11 }
 0xc70   : > { %v2305_v18 = vpop.permute.xlu1 %2304 }
 0xc71   : > { %v2314_v52 = vsel %vm2312_vm10, %v2311_v41, %v2305_v18  ;;  %v2325_v22 = vpop.permute.xlu0 %2324 }
 0xc72   : > { %v2329_v25 = vsel %vm2312_vm10, %v2328_v21, %v2325_v22  ;;  %3173 = vmatmul.mubr.msk.f32.vlgmr.msra.gmra.mrb[18].mxu0 %vm618_vm1, %v2314_v52 }
 0xc73   : > { %3261 = vmatpush3.bf16.msra.mxu0 %v3258_v58  ;;  %3195 = vmatmul.mubr.msk.f32.vlgmr.msra.gmra.mrb[18].mxu1 %vm618_vm1, %v2329_v25 }
 0xc74   : > { %3274 = vmatpush3.bf16.msra.mxu1 %v3273_v19  ;;  %3263 = vmatprep.subr.bf16.mxu0 %v3262_v20 }
 0xc75   : > { %3275 = vmatprep.subr.bf16.mxu1 %v3887_v0  ;;  %3183 = vmatprep.mubr.msk.f32.mxu0 %vm618_vm1, %v4352_v7  ;;  %v2952_v0 = vld [vmem:[%s4751_s14] ss:$0 sm:$0xff] }
 0xc76   : > { %3205 = vmatprep.mubr.msk.f32.mxu1 %vm3888_vm0, %v3889_v1 }
 0xc77   : > { %3265 = vmatpush3.bf16.msra.mxu0 %v3262_v20 }
 0xc78   : > { %3277 = vmatpush3.bf16.msra.mxu1 %v3276_v40 }
 0xc7a   : > { %3184 = vmatmul.mubr.msk.f32.vlgmr.msra.gmra.mrb[18].mxu0 %vm618_vm1, %v4358_v15  ;;  %v2955_v15 = vld [vmem:[%s4752_s20] ss:$0 sm:$0xff]  ;;  %s3905_s20 = smov [#allocation19]  }
 0xc7b   : > { %3206 = vmatmul.mubr.msk.f32.vlgmr.msra.gmra.mrb[20].mxu1 %vm618_vm1, %v4361_v16  ;;  %s3757_s15 = sshll.u32 %s3905_s20, 4  ;;  %s3758_s15 = int_to_ptr.vmem [resolvable:$false] %s3757_s15 }
 0xc7c   : > { %s3759_s28 = scalar_lea.vmem %s3758_s15, 512  ;;  %p3760_p8 = scmp.lt.s32.totalorder %s4593_s6, %s3758_s15 }
 0xc7d   : > { %p3761_p0 = scmp.lt.s32.totalorder %s3759_s28, %s3753_s16 }
 0xc7f   : > { %p3762_p5 = por %p3761_p0, %p3760_p8 }
 0xc81   : > { %p3763_p2 = pnand %p3762_p5, %p3756_p13 }
 0xd46   : > { %v2580_v43 = vpop.f32.mrb[18].mxu1 }
 0xd47   : > { %v3196_v34 = vpop.f32.mrb[19].mxu1 }
 0xd4d   : > { %v3185_v1 = vpop.f32.mrb[18].mxu0 }
 0xd4e   : > { %v2502_v7 = vadd.f32 %v3185_v1, %v2952_v0  ;;  %v2650_v47 = vpop.f32.mrb[20].mxu1  ;;  %v2485_v16 = vpop.f32.mrb[19].mxu0 }
 0xd4f   : > { %v2651_v46 = vadd.f32 %v2650_v47, %v2580_v43  ;;  %v2501_v26 = vadd.f32 %v2952_v0, %v2485_v16  ;;  %v3207_v48 = vpop.f32.mrb[21].mxu1 }
 0xd50   : > { %2663 = vst [vmem:[%s594_s30 + $0x8] sm:$0xff] %v2502_v7 }
 0xd51   : > { %v2661_v33 = vadd.f32 %v2955_v15, %v2651_v46  ;;  %2662 = vst [vmem:[%s594_s30] sm:$0xff] %v2501_v26 }
 0xd52   : > { %3766 = shalt.err (!%p3763_p2)
}
 0xd53   : > { %s3767_s30 = scalar_lea.hbm %s4607_s2, 256  ;;  %s3771_s23 = scalar_lea.hbm %s4753_s26, 512 }
 0xd54   : > { %p3768_p3 = scmp.ne.s32.totalorder %s4607_s2, %s3767_s30  ;;  %p3772_p9 = scmp.lt.u32.totalorder %s4607_s2, %s4753_s26 }
 0xd55   : > { %p3773_p11 = scmp.lt.u32.totalorder %s3771_s23, %s3767_s30  ;;  %p3775_p12 = scmp.lt.u32.totalorder %s3767_s30, %s4607_s2 }
 0xd56   : > { %p3769_p6 = pnand %p3768_p3, %p4755_p4 }
 0xd57   : > { %p3774_p10 = por %p3773_p11, %p3772_p9 }
 0xd58   : > { %p3770_p7 = pneg %p3769_p6 }
 0xd59   : > { %p3776_p1 = por %p3775_p12, %p3774_p10 }
 0xd5b   : > { %p3777_p13 = pnand %p3776_p1, %p3770_p7 }
 0xd5d   : > { %3780 = shalt.err (!%p3777_p13)
}
 0xd5e   : > { %s3906_s16 = smov 128   ;;  %2664 = vst [vmem:[%s4601_s21] sm:$0xff] %v2661_v33  ;;  %s2671_s15 = scalar_lea.sflag [#allocation21], %s4310_s11 }
 0xd5f   : > { %3308 = dma.vmem_to_hbm [thread:$0]  (%p4755_p4), %s4593_s6, 256, %s4607_s2, %s2666_s8, %s3906_s16, %s3906_s16, %s3902_s10  }
 0xd60   : > { %s3781_s28 = scalar_lea.vmem %s4614_s7, 128  ;;  %s3907_s30 = smov [#allocation20]  }
 0xd61   : > { %p3782_p8 = scmp.ne.s32.totalorder %s4614_s7, %s3781_s28  ;;  %s3785_s25 = sshll.u32 %s3907_s30, 4  ;;  %s3786_s25 = int_to_ptr.vmem [resolvable:$false] %s3785_s25 }
 0xd62   : > { %s3787_s17 = scalar_lea.vmem %s3786_s25, 256  ;;  %p3788_p2 = scmp.lt.s32.totalorder %s4614_s7, %s3786_s25 }
 0xd63   : > { %p3783_p0 = pnand %p3782_p8, %p4755_p4  ;;  %p3789_p3 = scmp.lt.s32.totalorder %s3787_s17, %s3781_s28 }
 0xd65   : > { %p3784_p5 = pneg %p3783_p0  ;;  %p3790_p6 = por %p3789_p3, %p3788_p2 }
 0xd67   : > { %p3791_p7 = pnand %p3790_p6, %p3784_p5 }
 0xd69   : > { %3794 = shalt.err (!%p3791_p7)
}
 0xd6a   : > { %s3795_s11 = scalar_lea.hbm %s4612_s13, 128  ;;  %s3799_s21 = scalar_lea.hbm %s4754_s22, 256 }
 0xd6b   : > { %p3796_p9 = scmp.ne.s32.totalorder %s4612_s13, %s3795_s11  ;;  %p3800_p12 = scmp.lt.u32.totalorder %s4612_s13, %s4754_s22 }
 0xd6c   : > { %p3801_p1 = scmp.lt.u32.totalorder %s3799_s21, %s3795_s11  ;;  %p3803_p8 = scmp.lt.u32.totalorder %s3795_s11, %s4612_s13 }
 0xd6d   : > { %p3797_p11 = pnand %p3796_p9, %p4755_p4 }
 0xd6e   : > { %p3802_p13 = por %p3801_p1, %p3800_p12 }
 0xd6f   : > { %p3798_p10 = pneg %p3797_p11 }
 0xd70   : > { %p3804_p0 = por %p3803_p8, %p3802_p13 }
 0xd72   : > { %p3805_p5 = pnand %p3804_p0, %p3798_p10 }
 0xd74   : > { %3808 = shalt.err (!%p3805_p5)
}
 0xd75   : > { %3309 = dma.vmem_to_hbm [thread:$0]  (%p4755_p4), %s4614_s7, 128, %s4612_s13, %s2671_s15  }
 0xd76 PF: > { %s2712_s23 = sand.u32 1, %s3861_s0   ;;  %p4756_p2 = scmp.ne.s32.totalorder %s4730_s29, 0 }
 0xd77   : > { %p4757_p3 = scmp.ge.s32.totalorder %s3873_s19, 2  ;;  %s2713_s14 = scalar_lea.sflag [#allocation7], %s2712_s23 }
 0xd79   : > { %p3339_p6 = pnand %p4757_p3, %p4756_p2 }
 0xd7b   : > { %3852 = dma.done.wait (!%p3339_p6), %s2713_s14, 256  }
 0xd7c   : > { %3854 = vsyncadd (!%p3339_p6), %s2713_s14, 4294967040  ;;  %s2722_s20 = scalar_lea.sflag [#allocation21], %s2712_s23 }
 0xd7d   : > { %3856 = dma.done.wait (!%p3339_p6), %s2722_s20, 128  }
 0xd7e   : > { %3858 = vsyncadd (!%p3339_p6), %s2722_s20, 4294967168  ;;  %p46_p4 = scmp.ge.s32.totalorder %s4194_s24, 4   ;;  %s4758_s0 = smov %s3865_s1 }
 0xd7f   : > { %s4759_s1 = smov %s3869_s18  ;;  %s4760_s18 = smov %s4205_s4 }
 0xd80   : > { %s4761_s19 = smov %s4194_s24  ;;  %48 = sbr.rel (!%p46_p4) target bundleno = 40 (0x28), region = 167 }
 0xd87   :  { %2727 = vsyncpa [#allocation6], 1 }
 0xd88   :  { %2729 = vsyncpa [#allocation6 + $0x1], 1 }
 0xd89   :  { %2730 = vsyncpa [#allocation9], 1 }
 0xd8a   :  { %2732 = vsyncpa [#allocation9 + $0x1], 1 }
 0xd8b   :  { %2733 = vsyncpa [#allocation12], 1 }
 0xd8c   :  { %2734 = vsyncpa [#allocation15], 1 }
 0xd8d   :  { %2735 = vsyncpa [#allocation18], 1 }
 0xd8e   :  { %2736 = vsyncpa [#allocation7], 1 }
 0xd8f   :  { %2738 = vsyncpa [#allocation7 + $0x1], 1 }
 0xd90   :  { %2739 = vsyncpa [#allocation21], 1 }
 0xd91   :  { %2741 = vsyncpa [#allocation21 + $0x1], 1 }

</bundles_post_ra>
